<compile_context>
chip_gen: v7x
topology: tpu7x:2x2x1
jax: 0.10.0
libtpu: 0.0.40
codegen_flags: <defaults>
</compile_context>

<pallas_src>
import functools
from typing import NamedTuple, Tuple

import jax
import jax.numpy as jnp
from jax.experimental import pallas as pl
from jax.experimental.pallas import tpu as pltpu


def _round_up(x: int, m: int) -> int:
    return ((x + m - 1) // m) * m


_VMEM_FALLBACK = 64 * 1024 * 1024   # v7x per-TensorCore VMEM (smallest generation)


def _vmem_capacity_bytes() -> int:
    try:
        return int(pltpu.get_tpu_info().vmem_capacity_bytes)
    except Exception:
        return _VMEM_FALLBACK


# ----------------------------------------------------------------------------
# Kernel: masked mean over the sequence axis, fused over 1 or 2 hidden tensors.
# ----------------------------------------------------------------------------
def _make_masked_mean_kernel(n_hidden: int):
    def kernel(*refs):
        h_refs = refs[:n_hidden]              # each (block_b, block_s, H)
        m_ref = refs[n_hidden]                # (block_b, block_s)  f32
        o_ref = refs[n_hidden + 1]            # (block_b, H)
        acc_ref = refs[n_hidden + 2]          # (block_b, H)  f32 scratch
        msum_ref = refs[n_hidden + 3]         # (block_b, 1)  f32 scratch

        s_step = pl.program_id(1)

        @pl.when(s_step == 0)
        def _():
            acc_ref[...] = jnp.zeros_like(acc_ref)
            msum_ref[...] = jnp.zeros_like(msum_ref)

        m = m_ref[...]                        # (bb, bs); padded seq tail is 0
        # Binary (0/1) attention mask assumed (as in the PyTorch module).
        # Use a select (NOT h * m): the tail of a partial input block holds
        # unspecified data (possibly NaN), and NaN * 0 would poison the sum.
        sel = (m[:, :, None] != 0.0)          # (bb, bs, 1) -> broadcast over H

        if n_hidden == 1:
            h = h_refs[0][...].astype(jnp.float32)
        else:
            # Fused "(first + last)" — the /2 is folded into the finalize divide.
            h = (h_refs[0][...].astype(jnp.float32)
                 + h_refs[1][...].astype(jnp.float32))

        # NOTE: the per-step sublane reduce routes through the XLU; it is hidden
        # under the multi-MiB hidden DMA today (memory-bound kernel).
        acc_ref[...] += jnp.sum(jnp.where(sel, h, 0.0), axis=1)       # (bb, H)
        msum_ref[...] += jnp.sum(m, axis=1, keepdims=True)            # (bb, 1)

        @pl.when(s_step == pl.num_programs(1) - 1)
        def _():
            # denom = n_hidden * sum(mask): folds the "(h_a + h_b)/2" average.
            # Rows with an all-zero mask divide by 0 (Inf/NaN) exactly like the
            # PyTorch reference; padded / out-of-bounds rows are never written.
            denom = msum_ref[...] if n_hidden == 1 else msum_ref[...] * float(n_hidden)
            o_ref[...] = (acc_ref[...] / denom).astype(o_ref.dtype)

    return kernel


# ----------------------------------------------------------------------------
# Tile selection from a per-generation VMEM budget.
# ----------------------------------------------------------------------------
def _choose_blocks(B, S, H, n_hidden, in_itemsize):
    """Pick (block_b, block_s).

    Targets: (a) per-step hidden DMA >= ~2 MiB (amortize the ~0.35 us/step grid
    overhead), (b) double-buffered working set well within this chip's VMEM
    (64 MiB/TC on v7x, 128 MiB on v5e/v6e), (c) >= 2 batch grid steps whenever
    B allows so the "parallel" batch axis can shard across both v7x TensorCores.
    """
    vmem_cap = _vmem_capacity_bytes()
    # Cap tile growth: beyond a few tens of MiB/step there is no bandwidth left
    # to gain, and on v7x (64 MiB/TC) we must leave headroom anyway.
    budget = min((vmem_cap * 3) // 4, 64 * 1024 * 1024)

    block_b = B if B < 8 else 8               # multiple of 8 (sublane-aligned)

    def hidden_bytes(bb, bs):                 # double-buffered hidden inputs
        return n_hidden * 2 * bb * bs * H * in_itemsize

    if hidden_bytes(block_b, S) <= budget:
        # Whole sequence in one reduction step (no mask padding at all).  Grow
        # the batch tile — keeping >= 2 batch steps — until each grid step moves
        # ~2 MiB of hidden data.
        block_s = S
        target = 2 * 1024 * 1024
        while (2 * block_b < B
               and hidden_bytes(block_b, block_s) < target
               and hidden_bytes(2 * block_b, block_s) <= budget):
            block_b *= 2
    else:
        # Multi-step reduction: block_s a multiple of 128 (keeps the 2-D mask
        # block lane-aligned), sized from the VMEM budget.
        per_128 = hidden_bytes(block_b, 128)
        block_s = max(128, (budget // per_128) * 128)
    return block_b, block_s


def _vmem_limit_bytes(block_b, block_s, H, n_hidden, in_itemsize, out_itemsize):
    bb = _round_up(max(block_b, 1), 8)
    h_lane = _round_up(H, 128)
    hidden = n_hidden * 2 * bb * _round_up(block_s, 8) * h_lane * in_itemsize
    mask = 2 * bb * _round_up(block_s, 128) * 4
    out = 2 * bb * h_lane * out_itemsize
    scratch = bb * h_lane * 4 + bb * 128 * 4
    working = hidden + mask + out + scratch
    vmem_cap = _vmem_capacity_bytes()
    # Never under-provision below the usual scoped default; raise when needed.
    return int(min(vmem_cap, max(working + (4 << 20), 32 << 20)))


# ----------------------------------------------------------------------------
# pallas_call wrapper
# ----------------------------------------------------------------------------
@functools.partial(jax.jit, static_argnames=("block_b", "block_s"))
def _masked_mean_pool_impl(hiddens, attention_mask, *, block_b, block_s):
    n_hidden = len(hiddens)
    B, S, H = hiddens[0].shape
    out_dtype = hiddens[0].dtype
    in_itemsize = jnp.dtype(hiddens[0].dtype).itemsize

    grid = (pl.cdiv(B, block_b), pl.cdiv(S, block_s))   # (parallel, reduction)

    # Only the small (B, S) mask is ever padded (zeros along the seq tail so the
    # unspecified tail of partial hidden blocks contributes nothing).  The big
    # (B, S, H) hidden tensors are never copied / padded in HBM.
    mask = attention_mask.astype(jnp.float32)
    Sp = grid[1] * block_s
    if Sp != S:
        mask = jnp.pad(mask, ((0, 0), (0, Sp - S)))

    h_spec = pl.BlockSpec((block_b, block_s, H), lambda i, k: (i, k, 0))
    m_spec = pl.BlockSpec((block_b, block_s), lambda i, k: (i, k))       # 2-D mask
    o_spec = pl.BlockSpec((block_b, H), lambda i, k: (i, 0))             # resident over k

    out = pl.pallas_call(
        _make_masked_mean_kernel(n_hidden),
        out_shape=jax.ShapeDtypeStruct((B, H), out_dtype),
        grid_spec=pltpu.PrefetchScalarGridSpec(
            num_scalar_prefetch=0,
            grid=grid,
            in_specs=[h_spec] * n_hidden + [m_spec],
            out_specs=o_spec,
            scratch_shapes=[
                pltpu.VMEM((block_b, H), jnp.float32),   # running masked sum
                pltpu.VMEM((block_b, 1), jnp.float32),   # running token count
            ],
        ),
        compiler_params=pltpu.CompilerParams(
            dimension_semantics=("parallel", "arbitrary"),
            vmem_limit_bytes=_vmem_limit_bytes(
                block_b, block_s, H, n_hidden, in_itemsize,
                jnp.dtype(out_dtype).itemsize),
        ),
    )(*hiddens, mask)
    return out


def masked_mean_pool(hiddens, attention_mask, *, block_b=None, block_s=None):
    """hiddens: tuple of 1 or 2 (B, S, H) arrays; attention_mask: (B, S)."""
    hiddens = tuple(hiddens)
    B, S, H = hiddens[0].shape
    n_hidden = len(hiddens)
    in_itemsize = jnp.dtype(hiddens[0].dtype).itemsize
    auto_b, auto_s = _choose_blocks(B, S, H, n_hidden, in_itemsize)
    if block_b is None:
        block_b = auto_b
    if block_s is None:
        block_s = auto_s
    # Layout constraints: batch tile multiple of 8 (or full B); seq tile multiple
    # of 128 (2-D mask lane axis) or the full S (single reduction step).
    assert block_b == B or block_b % 8 == 0, "block_b must be a multiple of 8 or B"
    assert block_s == S or block_s % 128 == 0, "block_s must be a multiple of 128 or S"
    return _masked_mean_pool_impl(hiddens, attention_mask,
                                  block_b=block_b, block_s=block_s)


def cls_pool(last_hidden):
    # TODO(synk): 'cls'/'cls_before_pooler' is a pure slice (no arithmetic); a
    # pallas_call would only add per-call overhead and force reading full
    # sequence tiles, so it stays as a plain XLA slice.
    return last_hidden[:, 0]


# ----------------------------------------------------------------------------
# Module-level forward (mirrors Pooler.forward)
# ----------------------------------------------------------------------------
class ModelOutputs(NamedTuple):
    last_hidden_state: jax.Array
    pooler_output: jax.Array
    hidden_states: Tuple[jax.Array, ...]


def pooler_forward(pooler_type, attention_mask, outputs, *,
                   block_b=None, block_s=None):
    assert pooler_type in ('cls', 'cls_before_pooler', 'avg',
                           'avg_top2', 'avg_first_last')
    last_hidden = outputs.last_hidden_state
    hidden_states = outputs.hidden_states
    if pooler_type in ('cls_before_pooler', 'cls'):
        return cls_pool(last_hidden)
    elif pooler_type == 'avg':
        return masked_mean_pool((last_hidden,), attention_mask,
                                block_b=block_b, block_s=block_s)
    elif pooler_type == 'avg_first_last':
        return masked_mean_pool((hidden_states[1], hidden_states[-1]),
                                attention_mask, block_b=block_b, block_s=block_s)
    elif pooler_type == 'avg_top2':
        return masked_mean_pool((hidden_states[-1], hidden_states[-2]),
                                attention_mask, block_b=block_b, block_s=block_s)
    else:
        raise NotImplementedError(pooler_type)


def pooler_reference(pooler_type, attention_mask, outputs):
    last_hidden = outputs.last_hidden_state
    hidden_states = outputs.hidden_states
    mask = attention_mask.astype(jnp.float32)
    if pooler_type in ('cls_before_pooler', 'cls'):
        return last_hidden[:, 0]
    if pooler_type == 'avg':
        h = last_hidden
    elif pooler_type == 'avg_first_last':
        h = (hidden_states[1] + hidden_states[-1]) / 2.0
    elif pooler_type == 'avg_top2':
        h = (hidden_states[-1] + hidden_states[-2]) / 2.0
    else:
        raise NotImplementedError(pooler_type)
    return (h * mask[:, :, None]).sum(1) / mask.sum(-1, keepdims=True)


# ----------------------------------------------------------------------------
# Demo / self-check
# ----------------------------------------------------------------------------
def _make_inputs(key, B, S, H, num_states):
    kh, km = jax.random.split(key)
    keys = jax.random.split(kh, num_states)
    hidden_states = tuple(jax.random.normal(k, (B, S, H), dtype=jnp.float32)
                          for k in keys)
    last_hidden = hidden_states[-1]
    pooler_output = jnp.tanh(last_hidden[:, 0])   # present in outputs, unused here
    lengths = jax.random.randint(km, (B,), 1, S + 1)
    attention_mask = (jnp.arange(S)[None, :] < lengths[:, None]).astype(jnp.int32)
    return attention_mask, ModelOutputs(last_hidden, pooler_output, hidden_states)


def _check(pooler_type, attention_mask, outputs, **blocks):
    out = jax.block_until_ready(
        pooler_forward(pooler_type, attention_mask, outputs, **blocks))
    ref = pooler_reference(pooler_type, attention_mask, outputs)
    assert out.shape == ref.shape, (pooler_type, out.shape, ref.shape)
    assert jnp.allclose(out, ref, atol=1e-5, rtol=1e-5), \
        f"mismatch vs reference for pooler_type={pooler_type}"


if __name__ == "__main__":
    key = jax.random.PRNGKey(0)
    k1, k2 = jax.random.split(key)

    # Config A: aligned shapes; explicit (block_b=8, block_s=128) -> grid (2, 2):
    # exercises the multi-step accumulator path and >=2 parallel batch steps.
    mask_a, outs_a = _make_inputs(k1, B=16, S=256, H=128, num_states=4)
    for ptype in ('cls', 'cls_before_pooler', 'avg', 'avg_first_last', 'avg_top2'):
        _check(ptype, mask_a, outs_a, block_b=8, block_s=128)
    # Same config with auto-selected tiles (single seq step, block_s = S).
    for ptype in ('avg', 'avg_first_last'):
        _check(ptype, mask_a, outs_a)

    # Config B: awkward shapes (B=10, S=200).  With block_s=128 the last seq and
    # batch blocks are partial: hidden tensors are NOT padded; only the small
    # (B, S) mask is zero-padded, and in-kernel jnp.where keeps tail garbage out.
    mask_b, outs_b = _make_inputs(k2, B=10, S=200, H=128, num_states=3)
    for ptype in ('avg', 'avg_top2'):
        _check(ptype, mask_b, outs_b, block_b=8, block_s=128)
        _check(ptype, mask_b, outs_b)   # auto tiles (block_s = S, partial batch)

    print("KERNEL_OK")
</pallas_src>

<mosaic_0001>
module attributes {stable_mosaic.version = 11 : i64} {
  func.func @kernel(%arg0: i32, %arg1: i32, %arg2: memref<8x128x128xf32, #tpu.memory_space<vmem>>, %arg3: memref<8x128xf32, #tpu.memory_space<vmem>>, %arg4: memref<8x128xf32, #tpu.memory_space<vmem>>, %arg5: memref<8x128xf32, #tpu.memory_space<vmem>>, %arg6: memref<8x1xf32, #tpu.memory_space<vmem>>) attributes {dimension_semantics = [#tpu.dimension_semantics<parallel>, #tpu.dimension_semantics<arbitrary>], iteration_bounds = array<i64: 2, 2>, scalar_prefetch = 0 : i64, scratch_operands = 2 : i64, tpu.core_type = #tpu.core_type<tc>, window_params = [{transform_indices = @transform_0, window_bounds = array<i64: 8, 128, 128>}, {transform_indices = @transform_1, window_bounds = array<i64: 8, 128>}, {transform_indices = @transform_2, window_bounds = array<i64: 8, 128>}]} {
    %c0_i32 = arith.constant 0 : i32
    %0 = arith.cmpi eq, %arg1, %c0_i32 : i32
    %1 = arith.extui %0 : i1 to i32
    %c0_i32_0 = arith.constant 0 : i32
    %2 = arith.cmpi ne, %1, %c0_i32_0 : i32
    scf.if %2 {
      %cst_17 = arith.constant 0.000000e+00 : f32
      %24 = vector.broadcast %cst_17 : f32 to vector<8x128xf32>
      %c0_18 = arith.constant 0 : index
      %c0_19 = arith.constant 0 : index
      %25 = vector.load %arg5[%c0_18, %c0_19] : memref<8x128xf32, #tpu.memory_space<vmem>>, vector<8x128xf32>
      tpu.vector_store %arg5[%c0_18, %c0_19], %24 {strides = array<i32>} : memref<8x128xf32, #tpu.memory_space<vmem>>, vector<8x128xf32>,
      %cst_20 = arith.constant 0.000000e+00 : f32
      %26 = vector.broadcast %cst_20 : f32 to vector<8x1xf32>
      %c0_21 = arith.constant 0 : index
      %c0_22 = arith.constant 0 : index
      %27 = vector.load %arg6[%c0_21, %c0_22] : memref<8x1xf32, #tpu.memory_space<vmem>>, vector<8x1xf32>
      tpu.vector_store %arg6[%c0_21, %c0_22], %26 {strides = array<i32>} : memref<8x1xf32, #tpu.memory_space<vmem>>, vector<8x1xf32>,
    } else {
    }
    %c0 = arith.constant 0 : index
    %c0_1 = arith.constant 0 : index
    %3 = vector.load %arg3[%c0, %c0_1] : memref<8x128xf32, #tpu.memory_space<vmem>>, vector<8x128xf32>
    %4 = vector.shape_cast %3 : vector<8x128xf32> to vector<8x128x1xf32>
    %cst = arith.constant 0.000000e+00 : f32
    %5 = vector.broadcast %cst : f32 to vector<8x128x1xf32>
    %6 = arith.cmpf one, %4, %5 : vector<8x128x1xf32>
    %c0_2 = arith.constant 0 : index
    %c0_3 = arith.constant 0 : index
    %c0_4 = arith.constant 0 : index
    %7 = vector.load %arg2[%c0_2, %c0_3, %c0_4] : memref<8x128x128xf32, #tpu.memory_space<vmem>>, vector<8x128x128xf32>
    %c0_5 = arith.constant 0 : index
    %c0_6 = arith.constant 0 : index
    %8 = vector.load %arg5[%c0_5, %c0_6] : memref<8x128xf32, #tpu.memory_space<vmem>>, vector<8x128xf32>
    %cst_7 = arith.constant 0.000000e+00 : f32
    %9 = vector.shape_cast %6 : vector<8x128x1xi1> to vector<8x128x1xi1>
    %10 = vector.broadcast %9 : vector<8x128x1xi1> to vector<8x128x128xi1>
    %11 = vector.broadcast %cst_7 : f32 to vector<8x128x128xf32>
    %12 = arith.select %10, %7, %11 : vector<8x128x128xi1>, vector<8x128x128xf32>
    %cst_8 = arith.constant dense<0.000000e+00> : vector<8x128xf32>
    %13 = vector.multi_reduction <add>, %12, %cst_8 [1] : vector<8x128x128xf32> to vector<8x128xf32>
    %14 = arith.addf %8, %13 : vector<8x128xf32>
    %c0_9 = arith.constant 0 : index
    %c0_10 = arith.constant 0 : index
    %15 = vector.load %arg5[%c0_9, %c0_10] : memref<8x128xf32, #tpu.memory_space<vmem>>, vector<8x128xf32>
    tpu.vector_store %arg5[%c0_9, %c0_10], %14 {strides = array<i32>} : memref<8x128xf32, #tpu.memory_space<vmem>>, vector<8x128xf32>,
    %c0_11 = arith.constant 0 : index
    %c0_12 = arith.constant 0 : index
    %16 = vector.load %arg6[%c0_11, %c0_12] : memref<8x1xf32, #tpu.memory_space<vmem>>, vector<8x1xf32>
    %cst_13 = arith.constant dense<0.000000e+00> : vector<8xf32>
    %17 = vector.multi_reduction <add>, %3, %cst_13 [1] : vector<8x128xf32> to vector<8xf32>
    %18 = vector.shape_cast %17 : vector<8xf32> to vector<8x1xf32>
    %19 = arith.addf %16, %18 : vector<8x1xf32>
    %c0_14 = arith.constant 0 : index
    %c0_15 = arith.constant 0 : index
    %20 = vector.load %arg6[%c0_14, %c0_15] : memref<8x1xf32, #tpu.memory_space<vmem>>, vector<8x1xf32>
    tpu.vector_store %arg6[%c0_14, %c0_15], %19 {strides = array<i32>} : memref<8x1xf32, #tpu.memory_space<vmem>>, vector<8x1xf32>,
    %c1_i32 = arith.constant 1 : i32
    %21 = arith.cmpi eq, %arg1, %c1_i32 : i32
    %22 = arith.extui %21 : i1 to i32
    %c0_i32_16 = arith.constant 0 : i32
    %23 = arith.cmpi ne, %22, %c0_i32_16 : i32
    scf.if %23 {
      %c0_17 = arith.constant 0 : index
      %c0_18 = arith.constant 0 : index
      %24 = vector.load %arg6[%c0_17, %c0_18] : memref<8x1xf32, #tpu.memory_space<vmem>>, vector<8x1xf32>
      %c0_19 = arith.constant 0 : index
      %c0_20 = arith.constant 0 : index
      %25 = vector.load %arg5[%c0_19, %c0_20] : memref<8x128xf32, #tpu.memory_space<vmem>>, vector<8x128xf32>
      %26 = vector.broadcast %24 : vector<8x1xf32> to vector<8x128xf32>
      %27 = arith.divf %25, %26 : vector<8x128xf32>
      %c0_21 = arith.constant 0 : index
      %c0_22 = arith.constant 0 : index
      %28 = vector.load %arg4[%c0_21, %c0_22] : memref<8x128xf32, #tpu.memory_space<vmem>>, vector<8x128xf32>
      tpu.vector_store %arg4[%c0_21, %c0_22], %27 {strides = array<i32>} : memref<8x128xf32, #tpu.memory_space<vmem>>, vector<8x128xf32>,
    } else {
    }
    return
  }
  func.func @transform_0(%arg0: i32, %arg1: i32) -> (i32, i32, i32) {
    %c0_i32 = arith.constant 0 : i32
    %c0_i32_0 = arith.constant 0 : i32
    return %arg0, %arg1, %c0_i32 : i32, i32, i32
  }
  func.func @transform_1(%arg0: i32, %arg1: i32) -> (i32, i32) {
    %c0_i32 = arith.constant 0 : i32
    return %arg0, %arg1 : i32, i32
  }
  func.func @transform_2(%arg0: i32, %arg1: i32) -> (i32, i32) {
    %c0_i32 = arith.constant 0 : i32
    %c0_i32_0 = arith.constant 0 : i32
    return %arg0, %c0_i32 : i32, i32
  }
}

</mosaic_0001>

<bundles_post_ra>
// kernel: _masked_mean_pool_impl.1
= control target key start
LH: loop header
LB: loop body
LE: loop exit
PB: predicated region body
PF: predicated region fallthrough
CT: control target
= control target key end

     0   :  { %7 = vsyncpa [#allocation5], 0  ;;  %s2639_s0 = inlined_call_operand.hbm [shape: f32[16,256,128], index: 0, kind: input, shape index: {}]   ;;  %s2640_s1 = inlined_call_operand.vmem [shape: f32[16,256], index: 1, kind: input, shape index: {}]   ;;  %s2641_s2 = inlined_call_operand.hbm [shape: f32[16,128], index: 2, kind: output, shape index: {}]  }
   0x1   :  { %9 = vsyncpa [#allocation5 + $0x1], 0 }
   0x2   :  { %10 = vsyncpa [#allocation6], 0 }
   0x3   :  { %12 = vsyncpa [#allocation6 + $0x1], 0  ;;  %s2038_s9 = smov 0   ;;  %s2040_s10 = smov 0  }
   0x4   :  { %s2042_s11 = smov 0   ;;  %s2044_s12 = smov 0  }
   0x5   :  { %s2046_s13 = smov 0   ;;  %s2048_s14 = smov 0  }
   0x6   :  { %s2050_s15 = smov 0   ;;  %s2052_s16 = smov 0  }
   0x7   :  { %s2054_s17 = smov 0   ;;  %s2056_s18 = smov 0  }
   0x8   :  { %s2058_s19 = smov 0  }
   0x9 LB: > { %2646 = sst [smem:[#allocation13_spill]] %s2004_s17  ;;  %s1751_s20 = sadd.s32 4294967295, %s2012_s19   ;;  %s2012_s19 = sphi %s2058_s19, %s18_s19   ;;  %s2008_s18 = sphi %s2056_s18, %s2657_s18   ;;  %s2004_s17 = sphi %s2054_s17, %s2656_s17   ;;  %s2000_s16 = sphi %s2052_s16, %s2655_s16   ;;  %s1996_s15 = sphi %s2050_s15, %s2654_s15   ;;  %s1992_s14 = sphi %s2048_s14, %s2663_s14   ;;  %s1988_s13 = sphi %s2046_s13, %s2662_s13   ;;  %s1984_s12 = sphi %s2044_s12, %s2661_s12   ;;  %s1980_s11 = sphi %s2042_s11, %s2660_s11   ;;  %s1976_s10 = sphi %s2040_s10, %s2659_s10   ;;  %s1972_s9 = sphi %s2038_s9, %s2658_s9  }
   0xa   : > { %2647 = sst [smem:[#allocation14_spill]] %s2008_s18  ;;  %s1752_s21 = sadd.s32 4294967294, %s2012_s19  }
   0xb   : > { %s27_s22 = sadd.s32 1, %s2004_s17  ;;  %s30_s23 = sadd.s32 1, %s2008_s18 }
   0xc   : > { %p28_p0 = scmp.ge.s32.totalorder %s27_s22, 2  ;;  %s39_s24 = sadd.s32 1, %s1992_s14 }
   0xd   : > { %p46_p1 = scmp.ne.s32.totalorder %s1992_s14, %s1988_s13  ;;  %p47_p2 = scmp.eq.s32.totalorder %s2012_s19, 0 }
   0xe   : > { %s2665_s22 = smov (%p28_p0, %s27_s22), 0  ;;  %s2667_s23 = smov (!%p28_p0, %s30_s23), %s2008_s18 }
   0xf   : > { %2648 = sst [smem:[#allocation15_spill]] %s2665_s22  ;;  %s35_s25 = ssub.s32 %s2004_s17, %s2665_s22 }
  0x10   : > { %p2104_p3 = por %p47_p2, %p46_p1  ;;  %p32_p4 = scmp.ge.s32.totalorder %s2667_s23, 2 }
  0x11   : > { %p52_p5 = scmp.ne.s32.totalorder %s1988_s13, %s1984_s12  ;;  %p53_p6 = scmp.eq.s32.totalorder %s1751_s20, 0 }
  0x12   : > { %s93_s27 = sadd.s32 1, %s1980_s11  ;;  %s2669_s23 = smov (%p32_p4, %s2667_s23), 0 }
  0x13   : > { %2650 = sst [smem:[#allocation16_spill]] %s2669_s23  ;;  %p2112_p7 = por %p53_p6, %p52_p5 }
  0x14   : > { %p103_p8 = scmp.ne.s32.totalorder %s1980_s11, %s1976_s10  ;;  %s34_s29 = ssub.s32 %s2008_s18, %s2669_s23 }
  0x15   : > { %p104_p9 = scmp.eq.s32.totalorder %s1751_s20, 3  ;;  %s36_s30 = sor.u32 %s35_s25, %s34_s29 }
  0x16   : > { %p91_p10 = scmp.eq.s32.totalorder %s34_s29, 0  ;;  %p37_p11 = scmp.eq.s32.totalorder %s36_s30, 0 }
  0x17   : > { %p2120_p12 = por %p104_p9, %p103_p8  ;;  %p109_p13 = scmp.ne.s32.totalorder %s1976_s10, %s1972_s9 }
  0x18   : > { %s2125_s4 = scalar_select %p91_p10, %s1980_s11, %s93_s27  }
  0x19   : > { %s2128_s5 = scalar_select %p37_p11, %s1992_s14, %s39_s24  }
  0x1a   : > { %p110_p0 = scmp.eq.s32.totalorder %s1752_s21, 3  ;;  %p1754_p2 = scmp.ge.s32.totalorder %s2012_s19, 4 }
  0x1c   : > { %p2132_p1 = por %p110_p0, %p109_p13  ;;  %126 = sbr.rel (%p1754_p2) target bundleno = 51 (0x33), region = 16 }
  0x23   : > { %s130_s7 = sand.u32 1, %s1992_s14   ;;  %s1757_s8 = sshll.u32 %s2004_s17, 4 }
  0x24   : > { %s1755_s12 = sshll.u32 %s130_s7, 10  ;;  %s1773_s20 = sshll.u32 %s2008_s18, 8 }
  0x25   : > { %s141_s21 = sadd.s32 %s1773_s20, %s1757_s8  ;;  %s134_s24 = scalar_lea.vmem [#allocation4], %s1755_s12 }
  0x26   : > { %s156_s25 = sshll.u32 %s134_s24, 4  ;;  %s1759_s27 = sshll.u32 %s141_s21, 7  ;;  %s157_s25 = int_to_ptr.vmem [resolvable:$true] %s156_s25 }
  0x27   : > { %s1774_s29 = scalar_select %p2104_p3, [#allocation0], [#allocation10] }
  0x28   : > { %s2014_s30 = smov 4096   ;;  %s2015_s22 = smov 2048  }
  0x29   : > { %1775 = sst [smem:[#allocation9]] (%p2104_p3), %s2014_s30  ;;  %s2016_s17 = smov 16  }
  0x2a   : > { %s148_s23 = sld [smem:[%s1774_s29]]   ;;  %s2017_s8 = smov 128  }
  0x2b   : > { %1776 = sst [smem:[#allocation9 + $0x1]] (%p2104_p3), %s2015_s22  ;;  %s143_s21 = scalar_lea.hbm %s2639_s0, %s1759_s27 }
  0x2c   : > { %1777 = sst [smem:[#allocation9 + $0x2]] (%p2104_p3), %s2016_s17  ;;  %s2018_s24 = smov 8  }
  0x2d   : > { %1778 = sst [smem:[#allocation9 + $0x3]] (%p2104_p3), %s2017_s8  ;;  %s131_s18 = scalar_lea.sflag [#allocation5], %s130_s7 }
  0x2e   : > { %1779 = sst [smem:[#allocation9 + $0x4]] (%p2104_p3), %s2017_s8  ;;  %s2019_s22 = smov [#allocation8]  }
  0x2f   : > { %1780 = sst [smem:[#allocation9 + $0x5]] (%p2104_p3), %s2018_s24 }
  0x30   : > { %s1760_s29 = sshll.u32 %s148_s23, 26 }
  0x31   : > { %s1761_s30 = sadd.s32 134217728, %s1760_s29 }
  0x32   : > { %1781 = dma.general (%p2104_p3), %s143_s21, 16384, %s157_s25, %s131_s18, %s2019_s22, [#allocation9], %s1761_s30, 0  }
  0x33 PF: > { %p1762_p4 = scmp.ge.s32.totalorder %s2012_s19, 1  ;;  %p188_p5 = scmp.lt.s32.totalorder %s2012_s19, 5 }
  0x35   : > { %p189_p6 = pnand %p1762_p4, %p188_p5 }
  0x36   : > { %s194_s17 = sand.u32 (!%p189_p6), 1, %s1988_s13  }
  0x37   : > { %192 = sbr.rel (%p189_p6) target bundleno = 686 (0x2ae), region = 28  ;;  %s1763_s27 = sshll.u32 (!%p189_p6), %s194_s17, 10 }
  0x38   : > { %s195_s8 = scalar_lea.sflag (!%p189_p6), [#allocation5], %s194_s17  ;;  %s2162_s12 = scalar_lea.vmem (!%p189_p6), [#allocation4], %s1763_s27 }
  0x3e   : > { %1963 = dma.done.wait (%p2112_p7), %s195_s8, 16384  }
  0x3f   : > { %1965 = vsyncadd (%p2112_p7), %s195_s8, 4294950912  ;;  %s224_s18 = sand.u32 1, %s1976_s10   ;;  %p229_p3 = scmp.lt.s32.totalorder %s2000_s16, 1 }
  0x40   : > { %s2172_s23 = sshll.u32 %s224_s18, 3  ;;  %p231_p8 = scmp.lt.s32.totalorder %s1996_s15, 1 }
  0x41   : > { %s230_s26 = scalar_select %p229_p3, %s2000_s16, 1 }
  0x42   : > { %s232_s7 = scalar_select %p231_p8, %s1996_s15, 1 }
  0x43   : > { %s1765_s25 = sshll.u32 %s230_s26, 1  ;;  %s226_s30 = scalar_lea.vmem [#allocation7], %s2172_s23 }
  0x44   : > { %s234_s20 = sadd.s32 %s1765_s25, %s232_s7  ;;  %p1767_p7 = scmp.ne.s32.totalorder %s1996_s15, 0 }
  0x45   : > { %s1766_s21 = sshll.u32 %s234_s20, 3  ;;  %vm242_vm0 = vcmask (!%p1767_p7), 7168   ;;  %v2020_v0 = vmov (!%p1767_p7), 0.0  }
  0x46   : > { %s2180_s29 = scalar_lea.vmem %s2640_s1, %s1766_s21  ;;  %240 = sbr.rel (%p1767_p7) target bundleno = 77 (0x4d), region = 36  ;;  %241 = vst [vmem:[#allocation2] sm:$0xff] (!%p1767_p7), %v2020_v0  ;;  %243 = vst.msk [vmem:[#allocation3] sm:$0xff] (!%p1767_p7), %vm242_vm0, %v2020_v0 }
  0x4d PF: > { %v245_v1 = vlaneseq  ;;  %v2187_v3 = vld [vmem:[%s2180_s29] sm:$0xff]  ;;  %v910_v26 = vld [vmem:[%s2162_s12 + $0x8] sm:$0xff]  ;;  %v909_v27 = vld [vmem:[%s2162_s12] sm:$0xff]  ;;  %p1768_p9 = scmp.ne.s32.totalorder %s1996_s15, 1 }
  0x4e   : > { %v911_v31 = vld [vmem:[%s2162_s12 + $0x10] sm:$0xff]  ;;  %v912_v37 = vld [vmem:[%s2162_s12 + $0x18] sm:$0xff]  ;;  %v926_v38 = vld [vmem:[%s2162_s12 + $0x88] sm:$0xff] }
  0x4f   : > { %v2184_v2 = vshrl.u32 %v245_v1, 7  ;;  %v925_v39 = vld [vmem:[%s2162_s12 + $0x80] sm:$0xff]  ;;  %v928_v46 = vld [vmem:[%s2162_s12 + $0x98] sm:$0xff]  ;;  %v927_v47 = vld [vmem:[%s2162_s12 + $0x90] sm:$0xff] }
  0x50   : > { %v913_v48 = vld [vmem:[%s2162_s12 + $0x20] sm:$0xff]  ;;  %v914_v52 = vld [vmem:[%s2162_s12 + $0x28] sm:$0xff] }
  0x51   : > { %v247_v4 = vsub.s32 0, %v2184_v2  ;;  %v314_v6 = vsub.s32 1, %v2184_v2  ;;  %v381_v8 = vsub.s32 2, %v2184_v2  ;;  %v448_v10 = vsub.s32 3, %v2184_v2  ;;  %v930_v59 = vld [vmem:[%s2162_s12 + $0xa8] sm:$0xff]  ;;  %v929_v60 = vld [vmem:[%s2162_s12 + $0xa0] sm:$0xff] }
  0x52   : > { %v515_v16 = vsub.s32 4, %v2184_v2  ;;  %v582_v56 = vsub.s32 5, %v2184_v2 }
  0x53   : > { %v248_v5 = vrot.slane %v2187_v3, %v247_v4  ;;  %v315_v7 = vrot.slane %v2187_v3, %v314_v6  ;;  %v382_v9 = vrot.slane %v2187_v3, %v381_v8  ;;  %v449_v11 = vrot.slane %v2187_v3, %v448_v10  ;;  %v915_v10 = vld [vmem:[%s2162_s12 + $0x30] sm:$0xff] }
  0x54   : > { %v2203_v19 = vrot.slane %v2187_v3, %v515_v16  ;;  %v2257_v6 = vrot.slane %v2187_v3, %v582_v56  ;;  %v916_v16 = vld [vmem:[%s2162_s12 + $0x38] sm:$0xff] }
  0x55   : > { %258 = vbcast.lane.b32.xlu1 %v248_v5, 272  ;;  %250 = vbcast.lane.b32.xlu0 %v248_v5, 256  ;;  %v920_v56 = vld [vmem:[%s2162_s12 + $0x58] sm:$0xff] }
  0x59   : > { %262 = vbcast.lane.b32.xlu1 %v248_v5, 280  ;;  %254 = vbcast.lane.b32.xlu0 %v248_v5, 264 }
  0x5d   : > { %270 = vbcast.lane.b32.xlu1 %v248_v5, 296  ;;  %266 = vbcast.lane.b32.xlu0 %v248_v5, 288 }
  0x61   : > { %278 = vbcast.lane.b32.xlu1 %v248_v5, 312  ;;  %274 = vbcast.lane.b32.xlu0 %v248_v5, 304 }
  0x65   : > { %286 = vbcast.lane.b32.xlu1 %v248_v5, 328  ;;  %282 = vbcast.lane.b32.xlu0 %v248_v5, 320 }
  0x69   : > { %294 = vbcast.lane.b32.xlu1 %v248_v5, 344  ;;  %290 = vbcast.lane.b32.xlu0 %v248_v5, 336 }
  0x6d   : > { %302 = vbcast.lane.b32.xlu1 %v248_v5, 360  ;;  %298 = vbcast.lane.b32.xlu0 %v248_v5, 352 }
  0x71   : > { %310 = vbcast.lane.b32.xlu1 %v248_v5, 376  ;;  %306 = vbcast.lane.b32.xlu0 %v248_v5, 368 }
  0x75   : > { %321 = vbcast.lane.b32.xlu1 %v315_v7, 264  ;;  %317 = vbcast.lane.b32.xlu0 %v315_v7, 256 }
  0x79   : > { %329 = vbcast.lane.b32.xlu1 %v315_v7, 280  ;;  %325 = vbcast.lane.b32.xlu0 %v315_v7, 272 }
  0x7d   : > { %337 = vbcast.lane.b32.xlu1 %v315_v7, 296  ;;  %333 = vbcast.lane.b32.xlu0 %v315_v7, 288 }
  0x81   : > { %345 = vbcast.lane.b32.xlu1 %v315_v7, 312  ;;  %341 = vbcast.lane.b32.xlu0 %v315_v7, 304 }
  0x85   : > { %353 = vbcast.lane.b32.xlu1 %v315_v7, 328  ;;  %349 = vbcast.lane.b32.xlu0 %v315_v7, 320 }
  0x89   : > { %361 = vbcast.lane.b32.xlu1 %v315_v7, 344  ;;  %357 = vbcast.lane.b32.xlu0 %v315_v7, 336 }
  0x8d   : > { %369 = vbcast.lane.b32.xlu1 %v315_v7, 360  ;;  %365 = vbcast.lane.b32.xlu0 %v315_v7, 352 }
  0x91   : > { %377 = vbcast.lane.b32.xlu1 %v315_v7, 376  ;;  %373 = vbcast.lane.b32.xlu0 %v315_v7, 368  ;;  %v649_v7 = vsub.s32 6, %v2184_v2 }
  0x95   : > { %388 = vbcast.lane.b32.xlu1 %v382_v9, 264  ;;  %384 = vbcast.lane.b32.xlu0 %v382_v9, 256 }
  0x99   : > { %396 = vbcast.lane.b32.xlu1 %v382_v9, 280  ;;  %392 = vbcast.lane.b32.xlu0 %v382_v9, 272 }
  0x9d   : > { %404 = vbcast.lane.b32.xlu1 %v382_v9, 296  ;;  %400 = vbcast.lane.b32.xlu0 %v382_v9, 288 }
  0xa1   : > { %412 = vbcast.lane.b32.xlu1 %v382_v9, 312  ;;  %408 = vbcast.lane.b32.xlu0 %v382_v9, 304 }
  0xa5   : > { %420 = vbcast.lane.b32.xlu1 %v382_v9, 328  ;;  %416 = vbcast.lane.b32.xlu0 %v382_v9, 320 }
  0xa9   : > { %428 = vbcast.lane.b32.xlu1 %v382_v9, 344  ;;  %424 = vbcast.lane.b32.xlu0 %v382_v9, 336 }
  0xad   : > { %436 = vbcast.lane.b32.xlu1 %v382_v9, 360  ;;  %432 = vbcast.lane.b32.xlu0 %v382_v9, 352 }
  0xb1   : > { %444 = vbcast.lane.b32.xlu1 %v382_v9, 376  ;;  %440 = vbcast.lane.b32.xlu0 %v382_v9, 368  ;;  %v931_v9 = vld [vmem:[%s2162_s12 + $0xb0] sm:$0xff] }
  0xb5   : > { %455 = vbcast.lane.b32.xlu1 %v449_v11, 264  ;;  %451 = vbcast.lane.b32.xlu0 %v449_v11, 256 }
  0xb9   : > { %463 = vbcast.lane.b32.xlu1 %v449_v11, 280  ;;  %459 = vbcast.lane.b32.xlu0 %v449_v11, 272 }
  0xbd   : > { %471 = vbcast.lane.b32.xlu1 %v449_v11, 296  ;;  %467 = vbcast.lane.b32.xlu0 %v449_v11, 288 }
  0xc1   : > { %479 = vbcast.lane.b32.xlu1 %v449_v11, 312  ;;  %475 = vbcast.lane.b32.xlu0 %v449_v11, 304 }
  0xc5   : > { %487 = vbcast.lane.b32.xlu1 %v449_v11, 328  ;;  %483 = vbcast.lane.b32.xlu0 %v449_v11, 320 }
  0xc7   : > { %v259_v12 = vpop.permute.xlu1 %258  ;;  %v251_v13 = vpop.permute.xlu0 %250 }
  0xc8   : > { %vm781_vm2 = vcmp.ne.f32.partialorder %v251_v13, 0.0  ;;  %vm783_vm3 = vcmp.ne.f32.partialorder %v259_v12, 0.0  ;;  %v932_v12 = vld [vmem:[%s2162_s12 + $0xb8] sm:$0xff] }
  0xc9   : > { %495 = vbcast.lane.b32.xlu1 %v449_v11, 344  ;;  %491 = vbcast.lane.b32.xlu0 %v449_v11, 336  ;;  %v1294_v32 = vsel %vm781_vm2, %v909_v27, 0.0  ;;  %v1296_v36 = vsel %vm783_vm3, %v911_v31, 0.0 }
  0xcb   : > { %v263_v14 = vpop.permute.xlu1 %262  ;;  %v255_v15 = vpop.permute.xlu0 %254 }
  0xcc   : > { %vm782_vm1 = vcmp.ne.f32.partialorder %v255_v15, 0.0  ;;  %vm784_vm4 = vcmp.ne.f32.partialorder %v263_v14, 0.0 }
  0xcd   : > { %503 = vbcast.lane.b32.xlu1 %v449_v11, 360  ;;  %499 = vbcast.lane.b32.xlu0 %v449_v11, 352  ;;  %v1295_v30 = vsel %vm782_vm1, %v910_v26, 0.0  ;;  %v1297_v43 = vsel %vm784_vm4, %v912_v37, 0.0 }
  0xce   : > { %v1422_v33 = vadd.f32 %v1295_v30, %v1294_v32  ;;  %v933_v32 = vld [vmem:[%s2162_s12 + $0xc0] sm:$0xff] }
  0xcf   : > { %v2198_v17 = vpop.permute.xlu1 %270  ;;  %v2200_v18 = vpop.permute.xlu0 %266 }
  0xd0   : > { %v1423_v40 = vadd.f32 %v1422_v33, %v1296_v36  ;;  %vm785_vm7 = vcmp.ne.f32.partialorder %v2200_v18, 0.0  ;;  %vm786_vm10 = vcmp.ne.f32.partialorder %v2198_v17, 0.0  ;;  %v2269_v18 = vrot.slane %v2187_v3, %v649_v7 }
  0xd1   : > { %511 = vbcast.lane.b32.xlu1 %v449_v11, 376  ;;  %507 = vbcast.lane.b32.xlu0 %v449_v11, 368  ;;  %v1298_v57 = vsel %vm785_vm7, %v913_v48, 0.0  ;;  %v1299_v0 = vsel %vm786_vm10, %v914_v52, 0.0 }
  0xd2   : > { %v1424_v49 = vadd.f32 %v1423_v40, %v1297_v43  ;;  %v934_v40 = vld [vmem:[%s2162_s12 + $0xc8] sm:$0xff] }
  0xd3   : > { %v2205_v20 = vpop.permute.xlu1 %278  ;;  %v2207_v21 = vpop.permute.xlu0 %274  ;;  %v918_v43 = vld [vmem:[%s2162_s12 + $0x48] sm:$0xff] }
  0xd4   : > { %v1425_v61 = vadd.f32 %v1424_v49, %v1298_v57  ;;  %vm787_vm13 = vcmp.ne.f32.partialorder %v2207_v21, 0.0  ;;  %vm788_vm0 = vcmp.ne.f32.partialorder %v2205_v20, 0.0 }
  0xd5   : > { %522 = vbcast.lane.b32.xlu1 %v2203_v19, 264  ;;  %518 = vbcast.lane.b32.xlu0 %v2203_v19, 256  ;;  %v1300_v21 = vsel %vm787_vm13, %v915_v10, 0.0  ;;  %v1301_v33 = vsel %vm788_vm0, %v916_v16, 0.0  ;;  %v943_v10 = vld [vmem:[%s2162_s12 + $0x110] sm:$0xff]  ;;  %v922_v16 = vld [vmem:[%s2162_s12 + $0x68] sm:$0xff] }
  0xd6   : > { %v1426_v11 = vadd.f32 %v1425_v61, %v1299_v0  ;;  %v941_v61 = vld [vmem:[%s2162_s12 + $0x100] sm:$0xff] }
  0xd7   : > { %v2211_v22 = vpop.permute.xlu1 %286  ;;  %v2213_v23 = vpop.permute.xlu0 %282 }
  0xd8   : > { %v1427_v30 = vadd.f32 %v1426_v11, %v1300_v21  ;;  %vm789_vm2 = vcmp.ne.f32.partialorder %v2213_v23, 0.0  ;;  %vm790_vm4 = vcmp.ne.f32.partialorder %v2211_v22, 0.0  ;;  %v921_v11 = vld [vmem:[%s2162_s12 + $0x60] sm:$0xff] }
  0xd9   : > { %530 = vbcast.lane.b32.xlu1 %v2203_v19, 280  ;;  %526 = vbcast.lane.b32.xlu0 %v2203_v19, 272  ;;  %v1303_v49 = vsel %vm790_vm4, %v918_v43, 0.0 }
  0xdb   : > { %v2217_v24 = vpop.permute.xlu1 %294  ;;  %v2219_v25 = vpop.permute.xlu0 %290 }
  0xdd   : > { %538 = vbcast.lane.b32.xlu1 %v2203_v19, 296  ;;  %534 = vbcast.lane.b32.xlu0 %v2203_v19, 288 }
  0xdf   : > { %v2225_v28 = vpop.permute.xlu1 %302  ;;  %v2227_v29 = vpop.permute.xlu0 %298 }
  0xe0   : > { %vm794_vm0 = vcmp.ne.f32.partialorder %v2225_v28, 0.0  ;;  %v940_v28 = vld [vmem:[%s2162_s12 + $0xf8] sm:$0xff] }
  0xe1   : > { %546 = vbcast.lane.b32.xlu1 %v2203_v19, 312  ;;  %542 = vbcast.lane.b32.xlu0 %v2203_v19, 304 }
  0xe3   : > { %v2232_v34 = vpop.permute.xlu1 %310  ;;  %v2234_v35 = vpop.permute.xlu0 %306 }
  0xe4   : > { %vm795_vm4 = vcmp.ne.f32.partialorder %v2234_v35, 0.0 }
  0xe5   : > { %554 = vbcast.lane.b32.xlu1 %v2203_v19, 328  ;;  %550 = vbcast.lane.b32.xlu0 %v2203_v19, 320 }
  0xe7   : > { %v322_v41 = vpop.permute.xlu1 %321  ;;  %v318_v42 = vpop.permute.xlu0 %317 }
  0xe8   : > { %vm798_vm5 = vcmp.ne.f32.partialorder %v322_v41, 0.0  ;;  %vm797_vm6 = vcmp.ne.f32.partialorder %v318_v42, 0.0 }
  0xe9   : > { %v1311_v44 = vsel %vm798_vm5, %v926_v38, 0.0  ;;  %v1310_v45 = vsel %vm797_vm6, %v925_v39, 0.0  ;;  %562 = vbcast.lane.b32.xlu1 %v2203_v19, 344  ;;  %558 = vbcast.lane.b32.xlu0 %v2203_v19, 336  ;;  %v917_v38 = vld [vmem:[%s2162_s12 + $0x40] sm:$0xff]  ;;  %v1428_v39 = vadd.f32 %v1427_v30, %v1301_v33  ;;  %vm791_vm6 = vcmp.ne.f32.partialorder %v2219_v25, 0.0 }
  0xea   : > { %v1443_v53 = vadd.f32 %v1311_v44, %v1310_v45  ;;  %v946_v30 = vld [vmem:[%s2162_s12 + $0x128] sm:$0xff] }
  0xeb   : > { %v330_v50 = vpop.permute.xlu1 %329  ;;  %v326_v51 = vpop.permute.xlu0 %325 }
  0xec   : > { %vm800_vm8 = vcmp.ne.f32.partialorder %v330_v50, 0.0  ;;  %vm799_vm9 = vcmp.ne.f32.partialorder %v326_v51, 0.0  ;;  %v919_v51 = vld [vmem:[%s2162_s12 + $0x50] sm:$0xff] }
  0xed   : > { %v1313_v54 = vsel %vm800_vm8, %v928_v46, 0.0  ;;  %v1312_v55 = vsel %vm799_vm9, %v927_v47, 0.0  ;;  %570 = vbcast.lane.b32.xlu1 %v2203_v19, 360  ;;  %566 = vbcast.lane.b32.xlu0 %v2203_v19, 352  ;;  %v935_v47 = vld [vmem:[%s2162_s12 + $0xd0] sm:$0xff]  ;;  %vm792_vm8 = vcmp.ne.f32.partialorder %v2217_v24, 0.0 }
  0xee   : > { %v1444_v58 = vadd.f32 %v1443_v53, %v1312_v55  ;;  %v936_v53 = vld [vmem:[%s2162_s12 + $0xd8] sm:$0xff] }
  0xef   : > { %v338_v62 = vpop.permute.xlu1 %337  ;;  %v334_v63 = vpop.permute.xlu0 %333 }
  0xf0   : > { %vm802_vm11 = vcmp.ne.f32.partialorder %v338_v62, 0.0  ;;  %v1445_v1 = vadd.f32 %v1444_v58, %v1313_v54  ;;  %vm801_vm12 = vcmp.ne.f32.partialorder %v334_v63, 0.0  ;;  %v1304_v58 = vsel %vm791_vm6, %v919_v51, 0.0  ;;  %v937_v62 = vld [vmem:[%s2162_s12 + $0xe0] sm:$0xff] }
  0xf1   : > { %v1315_v4 = vsel %vm802_vm11, %v930_v59, 0.0  ;;  %v1314_v5 = vsel %vm801_vm12, %v929_v60, 0.0  ;;  %578 = vbcast.lane.b32.xlu1 %v2203_v19, 376  ;;  %574 = vbcast.lane.b32.xlu0 %v2203_v19, 368  ;;  %v716_v19 = vsub.s32 7, %v2184_v2  ;;  %v942_v60 = vld [vmem:[%s2162_s12 + $0x108] sm:$0xff] }
  0xf2   : > { %v1446_v8 = vadd.f32 %v1445_v1, %v1314_v5  ;;  %v1305_v1 = vsel %vm792_vm8, %v920_v56, 0.0  ;;  %vm793_vm12 = vcmp.ne.f32.partialorder %v2227_v29, 0.0  ;;  %vm796_vm8 = vcmp.ne.f32.partialorder %v2232_v34, 0.0 }
  0xf3   : > { %v346_v13 = vpop.permute.xlu1 %345  ;;  %v342_v14 = vpop.permute.xlu0 %341  ;;  %v2276_v37 = vrot.slane %v2187_v3, %v716_v19  ;;  %v1302_v3 = vsel %vm789_vm2, %v917_v38, 0.0  ;;  %v1306_v29 = vsel %vm793_vm12, %v921_v11, 0.0  ;;  %v954_v11 = vld [vmem:[%s2162_s12 + $0x168] sm:$0xff] }
  0xf4   : > { %vm804_vm14 = vcmp.ne.f32.partialorder %v346_v13, 0.0  ;;  %v1447_v15 = vadd.f32 %v1446_v8, %v1315_v4  ;;  %vm803_vm15 = vcmp.ne.f32.partialorder %v342_v14, 0.0  ;;  %v1429_v46 = vadd.f32 %v1428_v39, %v1302_v3  ;;  %v938_v13 = vld [vmem:[%s2162_s12 + $0xe8] sm:$0xff]  ;;  %v947_v3 = vld [vmem:[%s2162_s12 + $0x130] sm:$0xff] }
  0xf5   : > { %v1316_v17 = vsel %vm803_vm15, %v931_v9, 0.0  ;;  %589 = vbcast.lane.b32.xlu1 %v2257_v6, 264  ;;  %585 = vbcast.lane.b32.xlu0 %v2257_v6, 256  ;;  %v1317_v26 = vsel %vm804_vm14, %v932_v12, 0.0  ;;  %v944_v9 = vld [vmem:[%s2162_s12 + $0x118] sm:$0xff] }
  0xf6   : > { %v1448_v27 = vadd.f32 %v1447_v15, %v1316_v17  ;;  %v1430_v52 = vadd.f32 %v1429_v46, %v1303_v49  ;;  %v924_v49 = vld [vmem:[%s2162_s12 + $0x78] sm:$0xff] }
  0xf7   : > { %v354_v31 = vpop.permute.xlu1 %353  ;;  %v350_v20 = vpop.permute.xlu0 %349 }
  0xf8   : > { %vm805_vm1 = vcmp.ne.f32.partialorder %v350_v20, 0.0  ;;  %v1449_v36 = vadd.f32 %v1448_v27, %v1317_v26  ;;  %vm806_vm3 = vcmp.ne.f32.partialorder %v354_v31, 0.0  ;;  %v1431_v25 = vadd.f32 %v1430_v52, %v1304_v58  ;;  %v945_v31 = vld [vmem:[%s2162_s12 + $0x120] sm:$0xff]  ;;  %v939_v20 = vld [vmem:[%s2162_s12 + $0xf0] sm:$0xff] }
  0xf9   : > { %652 = vbcast.lane.b32.xlu1 %v2269_v18, 256  ;;  %593 = vbcast.lane.b32.xlu0 %v2257_v6, 272  ;;  %v1318_v2 = vsel %vm805_vm1, %v933_v32, 0.0  ;;  %v1319_v45 = vsel %vm806_vm3, %v934_v40, 0.0 }
  0xfa   : > { %v1450_v44 = vadd.f32 %v1449_v36, %v1318_v2  ;;  %v1432_v12 = vadd.f32 %v1431_v25, %v1305_v1  ;;  %v1307_v2 = vsel %vm794_vm0, %v922_v16, 0.0 }
  0xfb   : > { %v362_v41 = vpop.permute.xlu1 %361  ;;  %v358_v42 = vpop.permute.xlu0 %357 }
  0xfc   : > { %vm807_vm5 = vcmp.ne.f32.partialorder %v358_v42, 0.0  ;;  %v1451_v50 = vadd.f32 %v1450_v44, %v1319_v45  ;;  %vm808_vm7 = vcmp.ne.f32.partialorder %v362_v41, 0.0  ;;  %v1433_v32 = vadd.f32 %v1432_v12, %v1306_v29  ;;  %v948_v44 = vld [vmem:[%s2162_s12 + $0x138] sm:$0xff]  ;;  %v923_v45 = vld [vmem:[%s2162_s12 + $0x70] sm:$0xff]  ;;  %v953_v12 = vld [vmem:[%s2162_s12 + $0x160] sm:$0xff] }
  0xfd   : > { %719 = vbcast.lane.b32.xlu1 %v2276_v37, 256  ;;  %656 = vbcast.lane.b32.xlu0 %v2269_v18, 264  ;;  %v1320_v22 = vsel %vm807_vm5, %v935_v47, 0.0  ;;  %v1321_v59 = vsel %vm808_vm7, %v936_v53, 0.0  ;;  %v1308_v35 = vsel %vm795_vm4, %v923_v45, 0.0 }
  0xfe   : > { %v1452_v57 = vadd.f32 %v1451_v50, %v1320_v22  ;;  %v1434_v46 = vadd.f32 %v1433_v32, %v1307_v2 }
  0xff   : > { %v370_v23 = vpop.permute.xlu1 %369  ;;  %v366_v48 = vpop.permute.xlu0 %365 }
 0x100   : > { %vm809_vm9 = vcmp.ne.f32.partialorder %v366_v48, 0.0  ;;  %v1453_v24 = vadd.f32 %v1452_v57, %v1321_v59  ;;  %vm810_vm13 = vcmp.ne.f32.partialorder %v370_v23, 0.0  ;;  %v1435_v56 = vadd.f32 %v1434_v46, %v1308_v35 }
 0x101   : > { %660 = vbcast.lane.b32.xlu1 %v2269_v18, 272  ;;  %723 = vbcast.lane.b32.xlu0 %v2276_v37, 264  ;;  %v1322_v7 = vsel %vm809_vm9, %v937_v62, 0.0  ;;  %v1323_v26 = vsel %vm810_vm13, %v938_v13, 0.0  ;;  %v1309_v59 = vsel %vm796_vm8, %v924_v49, 0.0  ;;  %vm1600_vm8 = vcmask 1042434  }
 0x102   : > { %v1454_v17 = vadd.f32 %v1453_v24, %v1322_v7  ;;  %v1436_v1 = vadd.f32 %v1435_v56, %v1309_v59  ;;  %v962_v56 = vld [vmem:[%s2162_s12 + $0x1a8] sm:$0xff] }
 0x103   : > { %v2291_v54 = vpop.permute.xlu1 %377  ;;  %v2293_v55 = vpop.permute.xlu0 %373 }
 0x104   : > { %vm811_vm1 = vcmp.ne.f32.partialorder %v2293_v55, 0.0  ;;  %v1455_v39 = vadd.f32 %v1454_v17, %v1323_v26  ;;  %vm812_vm5 = vcmp.ne.f32.partialorder %v2291_v54, 0.0  ;;  %v950_v54 = vld [vmem:[%s2162_s12 + $0x148] sm:$0xff]  ;;  %v949_v55 = vld [vmem:[%s2162_s12 + $0x140] sm:$0xff]  ;;  %v1437_v13 = vrot.slane %v1436_v1, 4  ;;  %v956_v26 = vld [vmem:[%s2162_s12 + $0x178] sm:$0xff] }
 0x105   : > { %727 = vbcast.lane.b32.xlu1 %v2276_v37, 272  ;;  %597 = vbcast.lane.b32.xlu0 %v2257_v6, 280  ;;  %v1324_v42 = vsel %vm811_vm1, %v939_v20, 0.0  ;;  %v1325_v52 = vsel %vm812_vm5, %v940_v28, 0.0 }
 0x106   : > { %v1456_v50 = vadd.f32 %v1455_v39, %v1324_v42  ;;  %v958_v39 = vld [vmem:[%s2162_s12 + $0x188] sm:$0xff] }
 0x107   : > { %v389_v63 = vpop.permute.xlu1 %388  ;;  %v385_v0 = vpop.permute.xlu0 %384 }
 0x108   : > { %vm814_vm10 = vcmp.ne.f32.partialorder %v389_v63, 0.0  ;;  %vm813_vm11 = vcmp.ne.f32.partialorder %v385_v0, 0.0  ;;  %v952_v63 = vld [vmem:[%s2162_s12 + $0x158] sm:$0xff]  ;;  %v951_v0 = vld [vmem:[%s2162_s12 + $0x150] sm:$0xff] }
 0x109   : > { %v1327_v4 = vsel %vm814_vm10, %v942_v60, 0.0  ;;  %v1326_v5 = vsel %vm813_vm11, %v941_v61, 0.0  ;;  %601 = vbcast.lane.b32.xlu1 %v2257_v6, 288  ;;  %664 = vbcast.lane.b32.xlu0 %v2269_v18, 280  ;;  %v1457_v60 = vadd.f32 %v1456_v50, %v1325_v52 }
 0x10a   : > { %v1464_v8 = vadd.f32 %v1327_v4, %v1326_v5 }
 0x10b   : > { %v397_v14 = vpop.permute.xlu1 %396  ;;  %v393_v15 = vpop.permute.xlu0 %392  ;;  %v1458_v7 = vrot.slane %v1457_v60, 4 }
 0x10c   : > { %vm816_vm14 = vcmp.ne.f32.partialorder %v397_v14, 0.0  ;;  %vm815_vm15 = vcmp.ne.f32.partialorder %v393_v15, 0.0 }
 0x10d   : > { %v1329_v19 = vsel %vm816_vm14, %v944_v9, 0.0  ;;  %v1328_v21 = vsel %vm815_vm15, %v943_v10, 0.0  ;;  %668 = vbcast.lane.b32.xlu1 %v2269_v18, 288  ;;  %731 = vbcast.lane.b32.xlu0 %v2276_v37, 280  ;;  %v1459_v17 = vadd.f32 %v1458_v7, %v1457_v60 }
 0x10e   : > { %v1465_v27 = vadd.f32 %v1464_v8, %v1328_v21 }
 0x10f   : > { %v405_v33 = vpop.permute.xlu1 %404  ;;  %v401_v36 = vpop.permute.xlu0 %400 }
 0x110   : > { %vm818_vm2 = vcmp.ne.f32.partialorder %v405_v33, 0.0  ;;  %v1466_v38 = vadd.f32 %v1465_v27, %v1329_v19  ;;  %vm817_vm3 = vcmp.ne.f32.partialorder %v401_v36, 0.0  ;;  %v955_v27 = vld [vmem:[%s2162_s12 + $0x170] sm:$0xff]  ;;  %v1460_v33 = vrot.slane %v1459_v17, 2 }
 0x111   : > { %v1331_v40 = vsel %vm818_vm2, %v946_v30, 0.0  ;;  %v1330_v41 = vsel %vm817_vm3, %v945_v31, 0.0  ;;  %735 = vbcast.lane.b32.xlu1 %v2276_v37, 288  ;;  %605 = vbcast.lane.b32.xlu0 %v2257_v6, 296  ;;  %v1438_v30 = vadd.f32 %v1437_v13, %v1436_v1 }
 0x112   : > { %v1467_v43 = vadd.f32 %v1466_v38, %v1330_v41 }
 0x113   : > { %v413_v47 = vpop.permute.xlu1 %412  ;;  %v409_v23 = vpop.permute.xlu0 %408  ;;  %v1439_v41 = vrot.slane %v1438_v30, 2 }
 0x114   : > { %vm820_vm6 = vcmp.ne.f32.partialorder %v413_v47, 0.0  ;;  %v1468_v48 = vadd.f32 %v1467_v43, %v1331_v40  ;;  %vm819_vm7 = vcmp.ne.f32.partialorder %v409_v23, 0.0  ;;  %v957_v40 = vld [vmem:[%s2162_s12 + $0x180] sm:$0xff]  ;;  %v960_v23 = vld [vmem:[%s2162_s12 + $0x198] sm:$0xff] }
 0x115   : > { %v1333_v22 = vsel %vm820_vm6, %v948_v44, 0.0  ;;  %v1332_v51 = vsel %vm819_vm7, %v947_v3, 0.0  ;;  %609 = vbcast.lane.b32.xlu1 %v2257_v6, 304  ;;  %672 = vbcast.lane.b32.xlu0 %v2269_v18, 296  ;;  %v1461_v3 = vadd.f32 %v1460_v33, %v1459_v17  ;;  %v1440_v49 = vadd.f32 %v1439_v41, %v1438_v30  ;;  %v965_v17 = vld [vmem:[%s2162_s12 + $0x1c0] sm:$0xff] }
 0x116   : > { %v1469_v53 = vadd.f32 %v1468_v48, %v1332_v51  ;;  %v959_v48 = vld [vmem:[%s2162_s12 + $0x190] sm:$0xff]  ;;  %vm1598_vm7 = vcmask 1041409   ;;  %v969_v41 = vld [vmem:[%s2162_s12 + $0x1e0] sm:$0xff] }
 0x117   : > { %v421_v57 = vpop.permute.xlu1 %420  ;;  %v417_v58 = vpop.permute.xlu0 %416  ;;  %v1462_v35 = vrot.slane %v1461_v3, 1 }
 0x118   : > { %vm822_vm9 = vcmp.ne.f32.partialorder %v421_v57, 0.0  ;;  %v1470_v34 = vadd.f32 %v1469_v53, %v1333_v22  ;;  %vm821_vm10 = vcmp.ne.f32.partialorder %v417_v58, 0.0  ;;  %v961_v57 = vld [vmem:[%s2162_s12 + $0x1a0] sm:$0xff]  ;;  %v1441_v58 = vrot.slane %v1440_v49, 1 }
 0x119   : > { %v1335_v61 = vsel %vm822_vm9, %v950_v54, 0.0  ;;  %v1334_v25 = vsel %vm821_vm10, %v949_v55, 0.0  ;;  %676 = vbcast.lane.b32.xlu1 %v2269_v18, 304  ;;  %739 = vbcast.lane.b32.xlu0 %v2276_v37, 296 }
 0x11a   : > { %v1471_v62 = vadd.f32 %v1470_v34, %v1334_v25  ;;  %v1463_v25 = vadd.f32 %v1462_v35, %v1461_v3  ;;  %v974_v35 = vld [vmem:[%s2162_s12 + $0x208] sm:$0xff] }
 0x11b   : > { %v429_v24 = vpop.permute.xlu1 %428  ;;  %v425_v4 = vpop.permute.xlu0 %424 }
 0x11c   : > { %vm824_vm11 = vcmp.ne.f32.partialorder %v429_v24, 0.0  ;;  %v1472_v5 = vadd.f32 %v1471_v62, %v1335_v61  ;;  %vm823_vm12 = vcmp.ne.f32.partialorder %v425_v4, 0.0  ;;  %v964_v24 = vld [vmem:[%s2162_s12 + $0x1b8] sm:$0xff]  ;;  %v963_v4 = vld [vmem:[%s2162_s12 + $0x1b0] sm:$0xff] }
 0x11d   : > { %v1337_v8 = vsel %vm824_vm11, %v952_v63, 0.0  ;;  %v1336_v9 = vsel %vm823_vm12, %v951_v0, 0.0  ;;  %743 = vbcast.lane.b32.xlu1 %v2276_v37, 304  ;;  %613 = vbcast.lane.b32.xlu0 %v2257_v6, 312 }
 0x11e   : > { %v1473_v10 = vadd.f32 %v1472_v5, %v1336_v9  ;;  %v1442_v5 = vadd.f32 %v1441_v58, %v1440_v49 }
 0x11f   : > { %v437_v14 = vpop.permute.xlu1 %436  ;;  %v433_v15 = vpop.permute.xlu0 %432 }
 0x120   : > { %vm826_vm13 = vcmp.ne.f32.partialorder %v437_v14, 0.0  ;;  %v1474_v16 = vadd.f32 %v1473_v10, %v1337_v8  ;;  %vm825_vm14 = vcmp.ne.f32.partialorder %v433_v15, 0.0 }
 0x121   : > { %v1339_v19 = vsel %vm826_vm13, %v954_v11, 0.0  ;;  %v1338_v21 = vsel %vm825_vm14, %v953_v12, 0.0  ;;  %617 = vbcast.lane.b32.xlu1 %v2257_v6, 320  ;;  %680 = vbcast.lane.b32.xlu0 %v2269_v18, 312  ;;  %v1599_v11 = vsel %vm1598_vm7, %v1463_v25, %v1442_v5  ;;  %v977_v5 = vld [vmem:[%s2162_s12 + $0x220] sm:$0xff] }
 0x122   : > { %v1475_v29 = vadd.f32 %v1474_v16, %v1338_v21  ;;  %v966_v16 = vld [vmem:[%s2162_s12 + $0x1c8] sm:$0xff] }
 0x123   : > { %v445_v31 = vpop.permute.xlu1 %444  ;;  %v441_v32 = vpop.permute.xlu0 %440 }
 0x124   : > { %vm828_vm15 = vcmp.ne.f32.partialorder %v445_v31, 0.0  ;;  %v1476_v20 = vadd.f32 %v1475_v29, %v1339_v19  ;;  %vm827_vm0 = vcmp.ne.f32.partialorder %v441_v32, 0.0  ;;  %v968_v31 = vld [vmem:[%s2162_s12 + $0x1d8] sm:$0xff]  ;;  %v967_v32 = vld [vmem:[%s2162_s12 + $0x1d0] sm:$0xff] }
 0x125   : > { %v1341_v36 = vsel %vm828_vm15, %v956_v26, 0.0  ;;  %v1340_v2 = vsel %vm827_vm0, %v955_v27, 0.0  ;;  %684 = vbcast.lane.b32.xlu1 %v2269_v18, 320  ;;  %747 = vbcast.lane.b32.xlu0 %v2276_v37, 312 }
 0x126   : > { %v1477_v38 = vadd.f32 %v1476_v20, %v1340_v2 }
 0x127   : > { %v456_v42 = vpop.permute.xlu1 %455  ;;  %v452_v43 = vpop.permute.xlu0 %451 }
 0x128   : > { %v1478_v44 = vadd.f32 %v1477_v38, %v1341_v36  ;;  %vm830_vm1 = vcmp.ne.f32.partialorder %v456_v42, 0.0  ;;  %vm829_vm2 = vcmp.ne.f32.partialorder %v452_v43, 0.0 }
 0x129   : > { %v1343_v45 = vsel %vm830_vm1, %v958_v39, 0.0  ;;  %v1342_v46 = vsel %vm829_vm2, %v957_v40, 0.0  ;;  %751 = vbcast.lane.b32.xlu1 %v2276_v37, 320  ;;  %621 = vbcast.lane.b32.xlu0 %v2257_v6, 328  ;;  %v970_v40 = vld [vmem:[%s2162_s12 + $0x1e8] sm:$0xff] }
 0x12a   : > { %v1479_v28 = vrot.slane %v1478_v44, 4  ;;  %v1485_v47 = vadd.f32 %v1343_v45, %v1342_v46 }
 0x12b   : > { %v464_v50 = vpop.permute.xlu1 %463  ;;  %v460_v22 = vpop.permute.xlu0 %459 }
 0x12c   : > { %v1480_v51 = vadd.f32 %v1479_v28, %v1478_v44  ;;  %vm832_vm3 = vcmp.ne.f32.partialorder %v464_v50, 0.0  ;;  %vm831_vm4 = vcmp.ne.f32.partialorder %v460_v22, 0.0  ;;  %v972_v28 = vld [vmem:[%s2162_s12 + $0x1f8] sm:$0xff] }
 0x12d   : > { %v1345_v52 = vsel %vm832_vm3, %v960_v23, 0.0  ;;  %v1344_v53 = vsel %vm831_vm4, %v959_v48, 0.0  ;;  %625 = vbcast.lane.b32.xlu1 %v2257_v6, 336  ;;  %688 = vbcast.lane.b32.xlu0 %v2269_v18, 328 }
 0x12e   : > { %v1481_v54 = vrot.slane %v1480_v51, 2  ;;  %v1486_v55 = vadd.f32 %v1485_v47, %v1344_v53  ;;  %v971_v47 = vld [vmem:[%s2162_s12 + $0x1f0] sm:$0xff] }
 0x12f   : > { %v472_v59 = vpop.permute.xlu1 %471  ;;  %v468_v34 = vpop.permute.xlu0 %467 }
 0x130   : > { %v1482_v60 = vadd.f32 %v1481_v54, %v1480_v51  ;;  %vm834_vm5 = vcmp.ne.f32.partialorder %v472_v59, 0.0  ;;  %v1487_v61 = vadd.f32 %v1486_v55, %v1345_v52  ;;  %vm833_vm6 = vcmp.ne.f32.partialorder %v468_v34, 0.0  ;;  %v973_v52 = vld [vmem:[%s2162_s12 + $0x200] sm:$0xff]  ;;  %v976_v34 = vld [vmem:[%s2162_s12 + $0x218] sm:$0xff] }
 0x131   : > { %v1347_v62 = vsel %vm834_vm5, %v962_v56, 0.0  ;;  %v1346_v63 = vsel %vm833_vm6, %v961_v57, 0.0  ;;  %692 = vbcast.lane.b32.xlu1 %v2269_v18, 336  ;;  %755 = vbcast.lane.b32.xlu0 %v2276_v37, 328 }
 0x132   : > { %v1483_v0 = vrot.slane %v1482_v60, 1  ;;  %v1488_v1 = vadd.f32 %v1487_v61, %v1346_v63 }
 0x133   : > { %v480_v7 = vpop.permute.xlu1 %479  ;;  %v476_v8 = vpop.permute.xlu0 %475 }
 0x134   : > { %v1484_v9 = vadd.f32 %v1483_v0, %v1482_v60  ;;  %vm836_vm9 = vcmp.ne.f32.partialorder %v480_v7, 0.0  ;;  %v1489_v10 = vadd.f32 %v1488_v1, %v1347_v62  ;;  %vm835_vm10 = vcmp.ne.f32.partialorder %v476_v8, 0.0  ;;  %v975_v60 = vld [vmem:[%s2162_s12 + $0x210] sm:$0xff] }
 0x135   : > { %v1349_v12 = vsel %vm836_vm9, %v964_v24, 0.0  ;;  %v1348_v13 = vsel %vm835_vm10, %v963_v4, 0.0  ;;  %759 = vbcast.lane.b32.xlu1 %v2276_v37, 336  ;;  %629 = vbcast.lane.b32.xlu0 %v2257_v6, 344  ;;  %v978_v4 = vld [vmem:[%s2162_s12 + $0x228] sm:$0xff]  ;;  %vm1602_vm9 = vcmask 1043459  }
 0x136   : > { %v2363_v14 = vsel %vm1600_vm8, %v1484_v9, %v1599_v11  ;;  %v1490_v15 = vadd.f32 %v1489_v10, %v1348_v13 }
 0x137   : > { %v488_v19 = vpop.permute.xlu1 %487  ;;  %v484_v21 = vpop.permute.xlu0 %483 }
 0x138   : > { %vm838_vm11 = vcmp.ne.f32.partialorder %v488_v19, 0.0  ;;  %v1491_v29 = vadd.f32 %v1490_v15, %v1349_v12  ;;  %vm837_vm12 = vcmp.ne.f32.partialorder %v484_v21, 0.0  ;;  %v980_v15 = vld [vmem:[%s2162_s12 + $0x238] sm:$0xff] }
 0x139   : > { %v1351_v26 = vsel %vm838_vm11, %v966_v16, 0.0  ;;  %v1350_v27 = vsel %vm837_vm12, %v965_v17, 0.0  ;;  %633 = vbcast.lane.b32.xlu1 %v2257_v6, 352  ;;  %696 = vbcast.lane.b32.xlu0 %v2269_v18, 344  ;;  %v979_v16 = vld [vmem:[%s2162_s12 + $0x230] sm:$0xff] }
 0x13a   : > { %v1492_v30 = vadd.f32 %v1491_v29, %v1350_v27 }
 0x13b   : > { %v496_v20 = vpop.permute.xlu1 %495  ;;  %v492_v33 = vpop.permute.xlu0 %491 }
 0x13c   : > { %vm840_vm13 = vcmp.ne.f32.partialorder %v496_v20, 0.0  ;;  %v1493_v36 = vadd.f32 %v1492_v30, %v1351_v26  ;;  %vm839_vm14 = vcmp.ne.f32.partialorder %v492_v33, 0.0  ;;  %v982_v30 = vld [vmem:[%s2162_s12 + $0x248] sm:$0xff] }
 0x13d   : > { %v1353_v2 = vsel %vm840_vm13, %v968_v31, 0.0  ;;  %v1352_v38 = vsel %vm839_vm14, %v967_v32, 0.0  ;;  %700 = vbcast.lane.b32.xlu1 %v2269_v18, 352  ;;  %763 = vbcast.lane.b32.xlu0 %v2276_v37, 344  ;;  %v981_v31 = vld [vmem:[%s2162_s12 + $0x240] sm:$0xff] }
 0x13e   : > { %v1494_v39 = vadd.f32 %v1493_v36, %v1352_v38 }
 0x13f   : > { %v504_v42 = vpop.permute.xlu1 %503  ;;  %v500_v43 = vpop.permute.xlu0 %499 }
 0x140   : > { %vm842_vm15 = vcmp.ne.f32.partialorder %v504_v42, 0.0  ;;  %v1495_v44 = vadd.f32 %v1494_v39, %v1353_v2  ;;  %vm841_vm0 = vcmp.ne.f32.partialorder %v500_v43, 0.0  ;;  %v984_v39 = vld [vmem:[%s2162_s12 + $0x258] sm:$0xff] }
 0x141   : > { %v1355_v3 = vsel %vm842_vm15, %v970_v40, 0.0  ;;  %v1354_v45 = vsel %vm841_vm0, %v969_v41, 0.0  ;;  %767 = vbcast.lane.b32.xlu1 %v2276_v37, 352  ;;  %637 = vbcast.lane.b32.xlu0 %v2257_v6, 360  ;;  %v983_v40 = vld [vmem:[%s2162_s12 + $0x250] sm:$0xff] }
 0x142   : > { %v1496_v46 = vadd.f32 %v1495_v44, %v1354_v45  ;;  %v986_v45 = vld [vmem:[%s2162_s12 + $0x268] sm:$0xff] }
 0x143   : > { %v512_v23 = vpop.permute.xlu1 %511  ;;  %v508_v48 = vpop.permute.xlu0 %507 }
 0x144   : > { %vm844_vm1 = vcmp.ne.f32.partialorder %v512_v23, 0.0  ;;  %v1497_v49 = vadd.f32 %v1496_v46, %v1355_v3  ;;  %vm843_vm2 = vcmp.ne.f32.partialorder %v508_v48, 0.0  ;;  %v985_v46 = vld [vmem:[%s2162_s12 + $0x260] sm:$0xff] }
 0x145   : > { %v1357_v50 = vsel %vm844_vm1, %v972_v28, 0.0  ;;  %v1356_v22 = vsel %vm843_vm2, %v971_v47, 0.0  ;;  %641 = vbcast.lane.b32.xlu1 %v2257_v6, 368  ;;  %704 = vbcast.lane.b32.xlu0 %v2269_v18, 360 }
 0x146   : > { %v1498_v51 = vadd.f32 %v1497_v49, %v1356_v22  ;;  %v988_v22 = vld [vmem:[%s2162_s12 + $0x278] sm:$0xff] }
 0x147   : > { %v523_v53 = vpop.permute.xlu1 %522  ;;  %v519_v54 = vpop.permute.xlu0 %518 }
 0x148   : > { %v1499_v55 = vadd.f32 %v1498_v51, %v1357_v50  ;;  %vm846_vm3 = vcmp.ne.f32.partialorder %v523_v53, 0.0  ;;  %vm845_vm4 = vcmp.ne.f32.partialorder %v519_v54, 0.0  ;;  %v987_v51 = vld [vmem:[%s2162_s12 + $0x270] sm:$0xff] }
 0x149   : > { %v1359_v56 = vsel %vm846_vm3, %v974_v35, 0.0  ;;  %v1358_v57 = vsel %vm845_vm4, %v973_v52, 0.0  ;;  %708 = vbcast.lane.b32.xlu1 %v2269_v18, 368  ;;  %771 = vbcast.lane.b32.xlu0 %v2276_v37, 360  ;;  %vm1604_vm4 = vcmask 1044484  }
 0x14a   : > { %v1500_v58 = vrot.slane %v1499_v55, 4  ;;  %v1506_v59 = vadd.f32 %v1359_v56, %v1358_v57 }
 0x14b   : > { %v531_v61 = vpop.permute.xlu1 %530  ;;  %v527_v25 = vpop.permute.xlu0 %526 }
 0x14c   : > { %v1501_v62 = vadd.f32 %v1500_v58, %v1499_v55  ;;  %vm848_vm5 = vcmp.ne.f32.partialorder %v531_v61, 0.0  ;;  %vm847_vm6 = vcmp.ne.f32.partialorder %v527_v25, 0.0 }
 0x14d   : > { %v1361_v63 = vsel %vm848_vm5, %v976_v34, 0.0  ;;  %v1360_v0 = vsel %vm847_vm6, %v975_v60, 0.0  ;;  %775 = vbcast.lane.b32.xlu1 %v2276_v37, 368  ;;  %645 = vbcast.lane.b32.xlu0 %v2257_v6, 376 }
 0x14e   : > { %v1502_v1 = vrot.slane %v1501_v62, 2  ;;  %v1507_v24 = vadd.f32 %v1506_v59, %v1360_v0 }
 0x14f   : > { %v539_v7 = vpop.permute.xlu1 %538  ;;  %v535_v8 = vpop.permute.xlu0 %534 }
 0x150   : > { %v1503_v9 = vadd.f32 %v1502_v1, %v1501_v62  ;;  %vm850_vm7 = vcmp.ne.f32.partialorder %v539_v7, 0.0  ;;  %v1508_v10 = vadd.f32 %v1507_v24, %v1361_v63  ;;  %vm849_vm8 = vcmp.ne.f32.partialorder %v535_v8, 0.0  ;;  %v1886_v24 = vld [vmem:[%s2180_s29] sm:$0xff] }
 0x151   : > { %v1363_v11 = vsel %vm850_vm7, %v978_v4, 0.0  ;;  %v1362_v12 = vsel %vm849_vm8, %v977_v5, 0.0  ;;  %779 = vbcast.lane.b32.xlu1 %v2276_v37, 376  ;;  %712 = vbcast.lane.b32.xlu0 %v2269_v18, 376 }
 0x152   : > { %v1504_v6 = vrot.slane %v1503_v9, 1  ;;  %v1509_v13 = vadd.f32 %v1508_v10, %v1362_v12 }
 0x153   : > { %v547_v17 = vpop.permute.xlu1 %546  ;;  %v543_v19 = vpop.permute.xlu0 %542 }
 0x154   : > { %v1505_v21 = vadd.f32 %v1504_v6, %v1503_v9  ;;  %vm852_vm10 = vcmp.ne.f32.partialorder %v547_v17, 0.0  ;;  %v1510_v29 = vadd.f32 %v1509_v13, %v1363_v11  ;;  %vm851_vm11 = vcmp.ne.f32.partialorder %v543_v19, 0.0 }
 0x155   : > { %v1365_v26 = vsel %vm852_vm10, %v980_v15, 0.0  ;;  %v1364_v27 = vsel %vm851_vm11, %v979_v16, 0.0 }
 0x156   : > { %v1603_v37 = vsel %vm1602_vm9, %v1505_v21, %v2363_v14  ;;  %v1511_v18 = vadd.f32 %v1510_v29, %v1364_v27 }
 0x157   : > { %v555_v32 = vpop.permute.xlu1 %554  ;;  %v551_v20 = vpop.permute.xlu0 %550 }
 0x158   : > { %vm854_vm12 = vcmp.ne.f32.partialorder %v555_v32, 0.0  ;;  %v1512_v33 = vadd.f32 %v1511_v18, %v1365_v26  ;;  %vm853_vm13 = vcmp.ne.f32.partialorder %v551_v20, 0.0 }
 0x159   : > { %v1367_v36 = vsel %vm854_vm12, %v982_v30, 0.0  ;;  %v1366_v2 = vsel %vm853_vm13, %v981_v31, 0.0 }
 0x15a   : > { %v1513_v38 = vadd.f32 %v1512_v33, %v1366_v2  ;;  %v989_v2 = vld [vmem:[%s2162_s12 + $0x280] sm:$0xff] }
 0x15b   : > { %v563_v41 = vpop.permute.xlu1 %562  ;;  %v559_v42 = vpop.permute.xlu0 %558 }
 0x15c   : > { %vm856_vm14 = vcmp.ne.f32.partialorder %v563_v41, 0.0  ;;  %v1514_v14 = vadd.f32 %v1513_v38, %v1367_v36  ;;  %vm855_vm15 = vcmp.ne.f32.partialorder %v559_v42, 0.0  ;;  %v990_v36 = vld [vmem:[%s2162_s12 + $0x288] sm:$0xff] }
 0x15d   : > { %v1369_v43 = vsel %vm856_vm14, %v984_v39, 0.0  ;;  %v1368_v44 = vsel %vm855_vm15, %v983_v40, 0.0  ;;  %v991_v40 = vld [vmem:[%s2162_s12 + $0x290] sm:$0xff] }
 0x15e   : > { %v1515_v3 = vadd.f32 %v1514_v14, %v1368_v44  ;;  %v1005_v14 = vld [vmem:[%s2162_s12 + $0x300] sm:$0xff] }
 0x15f   : > { %v571_v28 = vpop.permute.xlu1 %570  ;;  %v567_v47 = vpop.permute.xlu0 %566  ;;  %v1021_v44 = vld [vmem:[%s2162_s12 + $0x380] sm:$0xff] }
 0x160   : > { %vm858_vm0 = vcmp.ne.f32.partialorder %v571_v28, 0.0  ;;  %v1516_v23 = vadd.f32 %v1515_v3, %v1369_v43  ;;  %vm857_vm1 = vcmp.ne.f32.partialorder %v567_v47, 0.0  ;;  %v1006_v43 = vld [vmem:[%s2162_s12 + $0x308] sm:$0xff]  ;;  %v992_v28 = vld [vmem:[%s2162_s12 + $0x298] sm:$0xff] }
 0x161   : > { %v1371_v48 = vsel %vm858_vm0, %v986_v45, 0.0  ;;  %v1370_v49 = vsel %vm857_vm1, %v985_v46, 0.0  ;;  %v1022_v3 = vld [vmem:[%s2162_s12 + $0x388] sm:$0xff] }
 0x162   : > { %v1517_v50 = vadd.f32 %v1516_v23, %v1370_v49  ;;  %v1023_v49 = vld [vmem:[%s2162_s12 + $0x390] sm:$0xff] }
 0x163   : > { %v579_v35 = vpop.permute.xlu1 %578  ;;  %v575_v52 = vpop.permute.xlu0 %574 }
 0x164   : > { %vm860_vm2 = vcmp.ne.f32.partialorder %v579_v35, 0.0  ;;  %v1518_v53 = vadd.f32 %v1517_v50, %v1371_v48  ;;  %vm859_vm3 = vcmp.ne.f32.partialorder %v575_v52, 0.0  ;;  %v1007_v48 = vld [vmem:[%s2162_s12 + $0x310] sm:$0xff]  ;;  %v993_v52 = vld [vmem:[%s2162_s12 + $0x2a0] sm:$0xff] }
 0x165   : > { %v1373_v54 = vsel %vm860_vm2, %v988_v22, 0.0  ;;  %v1372_v55 = vsel %vm859_vm3, %v987_v51, 0.0 }
 0x166   : > { %v1519_v56 = vadd.f32 %v1518_v53, %v1372_v55  ;;  %v1008_v55 = vld [vmem:[%s2162_s12 + $0x318] sm:$0xff] }
 0x167   : > { %v590_v57 = vpop.permute.xlu1 %589  ;;  %v586_v58 = vpop.permute.xlu0 %585 }
 0x168   : > { %v1520_v59 = vadd.f32 %v1519_v56, %v1373_v54  ;;  %vm862_vm5 = vcmp.ne.f32.partialorder %v590_v57, 0.0  ;;  %vm861_vm6 = vcmp.ne.f32.partialorder %v586_v58, 0.0  ;;  %v1024_v56 = vld [vmem:[%s2162_s12 + $0x398] sm:$0xff] }
 0x169   : > { %v1375_v38 = vsel %vm862_vm5, %v990_v36, 0.0  ;;  %v1374_v39 = vsel %vm861_vm6, %v989_v2, 0.0 }
 0x16a   : > { %v1521_v34 = vrot.slane %v1520_v59, 4  ;;  %v1527_v45 = vadd.f32 %v1375_v38, %v1374_v39  ;;  %v996_v38 = vld [vmem:[%s2162_s12 + $0x2b8] sm:$0xff] }
 0x16b   : > { %v653_v60 = vpop.permute.xlu1 %652  ;;  %v594_v61 = vpop.permute.xlu0 %593 }
 0x16c   : > { %v1522_v25 = vadd.f32 %v1521_v34, %v1520_v59  ;;  %vm863_vm7 = vcmp.ne.f32.partialorder %v594_v61, 0.0  ;;  %vm877_vm8 = vcmp.ne.f32.partialorder %v653_v60, 0.0  ;;  %v994_v34 = vld [vmem:[%s2162_s12 + $0x2a8] sm:$0xff] }
 0x16d   : > { %v1376_v46 = vsel %vm863_vm7, %v991_v40, 0.0  ;;  %v1390_v47 = vsel %vm877_vm8, %v1005_v14, 0.0  ;;  %v1011_v40 = vld [vmem:[%s2162_s12 + $0x330] sm:$0xff] }
 0x16e   : > { %v1523_v62 = vrot.slane %v1522_v25, 2  ;;  %v1528_v53 = vadd.f32 %v1527_v45, %v1376_v46  ;;  %v1027_v14 = vld [vmem:[%s2162_s12 + $0x3b0] sm:$0xff] }
 0x16f   : > { %v720_v63 = vpop.permute.xlu1 %719  ;;  %v657_v0 = vpop.permute.xlu0 %656 }
 0x170   : > { %v1524_v1 = vadd.f32 %v1523_v62, %v1522_v25  ;;  %1616 = vadd.xlane.f32.xlu0 %v1886_v24  ;;  %vm878_vm9 = vcmp.ne.f32.partialorder %v657_v0, 0.0  ;;  %vm893_vm10 = vcmp.ne.f32.partialorder %v720_v63, 0.0  ;;  %v1009_v25 = vld [vmem:[%s2162_s12 + $0x320] sm:$0xff] }
 0x171   : > { %v1391_v23 = vsel %vm878_vm9, %v1006_v43, 0.0  ;;  %v1406_v51 = vsel %vm893_vm10, %v1021_v44, 0.0  ;;  %v1025_v62 = vld [vmem:[%s2162_s12 + $0x3a0] sm:$0xff] }
 0x172   : > { %v1525_v4 = vrot.slane %v1524_v1, 1  ;;  %v1548_v57 = vadd.f32 %v1391_v23, %v1390_v47 }
 0x173   : > { %v2405_v5 = vpop.permute.xlu1 %660  ;;  %v724_v7 = vpop.permute.xlu0 %723 }
 0x174   : > { %v1526_v8 = vadd.f32 %v1525_v4, %v1524_v1  ;;  %vm894_vm11 = vcmp.ne.f32.partialorder %v724_v7, 0.0  ;;  %vm879_vm13 = vcmp.ne.f32.partialorder %v2405_v5, 0.0  ;;  %v995_v5 = vld [vmem:[%s2162_s12 + $0x2b0] sm:$0xff] }
 0x175   : > { %v1407_v35 = vsel %vm894_vm11, %v1022_v3, 0.0  ;;  %v1392_v58 = vsel %vm879_vm13, %v1007_v48, 0.0  ;;  %v997_v3 = vld [vmem:[%s2162_s12 + $0x2c0] sm:$0xff]  ;;  %v998_v48 = vld [vmem:[%s2162_s12 + $0x2c8] sm:$0xff] }
 0x176   : > { %v2407_v9 = vsel %vm1604_vm4, %v1526_v8, %v1603_v37  ;;  %v1569_v60 = vadd.f32 %v1407_v35, %v1406_v51  ;;  %v1549_v7 = vadd.f32 %v1548_v57, %v1392_v58  ;;  %v1013_v35 = vld [vmem:[%s2162_s12 + $0x340] sm:$0xff] }
 0x177   : > { %v2409_v10 = vpop.permute.xlu1 %727  ;;  %v598_v11 = vpop.permute.xlu0 %597 }
 0x178   : > { %vm864_vm12 = vcmp.ne.f32.partialorder %v598_v11, 0.0  ;;  %vm895_vm14 = vcmp.ne.f32.partialorder %v2409_v10, 0.0  ;;  %v1010_v11 = vld [vmem:[%s2162_s12 + $0x328] sm:$0xff] }
 0x179   : > { %v1377_v54 = vsel %vm864_vm12, %v992_v28, 0.0  ;;  %v1408_v59 = vsel %vm895_vm14, %v1023_v49, 0.0  ;;  %v1012_v28 = vld [vmem:[%s2162_s12 + $0x338] sm:$0xff] }
 0x17a   : > { %v1529_v1 = vadd.f32 %v1528_v53, %v1377_v54  ;;  %v1570_v8 = vadd.f32 %v1569_v60, %v1408_v59  ;;  %v1014_v59 = vld [vmem:[%s2162_s12 + $0x348] sm:$0xff] }
 0x17b   : > { %v2411_v12 = vpop.permute.xlu1 %601  ;;  %v2413_v6 = vpop.permute.xlu0 %664  ;;  %v1030_v60 = vld [vmem:[%s2162_s12 + $0x3c8] sm:$0xff] }
 0x17c   : > { %vm865_vm15 = vcmp.ne.f32.partialorder %v2411_v12, 0.0  ;;  %vm880_vm0 = vcmp.ne.f32.partialorder %v2413_v6, 0.0 }
 0x17d   : > { %v1378_v61 = vsel %vm865_vm15, %v993_v52, 0.0  ;;  %v1393_v24 = vsel %vm880_vm0, %v1008_v55, 0.0  ;;  %v1029_v52 = vld [vmem:[%s2162_s12 + $0x3c0] sm:$0xff] }
 0x17e   : > { %v1530_v12 = vadd.f32 %v1529_v1, %v1378_v61  ;;  %v1550_v36 = vadd.f32 %v1549_v7, %v1393_v24  ;;  %v1015_v24 = vld [vmem:[%s2162_s12 + $0x350] sm:$0xff] }
 0x17f   : > { %v2415_v13 = vpop.permute.xlu1 %668  ;;  %v2417_v15 = vpop.permute.xlu0 %731 }
 0x180   : > { %vm896_vm1 = vcmp.ne.f32.partialorder %v2417_v15, 0.0  ;;  %vm881_vm3 = vcmp.ne.f32.partialorder %v2415_v13, 0.0 }
 0x181   : > { %v1409_v4 = vsel %vm896_vm1, %v1024_v56, 0.0  ;;  %v1394_v6 = vsel %vm881_vm3, %v1009_v25, 0.0  ;;  %v999_v56 = vld [vmem:[%s2162_s12 + $0x2d0] sm:$0xff] }
 0x182   : > { %v1551_v43 = vadd.f32 %v1550_v36, %v1394_v6  ;;  %v1032_v6 = vld [vmem:[%s2162_s12 + $0x3d8] sm:$0xff] }
 0x183   : > { %v2419_v16 = vpop.permute.xlu1 %735  ;;  %v2421_v17 = vpop.permute.xlu0 %605 }
 0x184   : > { %vm866_vm2 = vcmp.ne.f32.partialorder %v2421_v17, 0.0  ;;  %vm897_vm4 = vcmp.ne.f32.partialorder %v2419_v16, 0.0  ;;  %v1026_v16 = vld [vmem:[%s2162_s12 + $0x3a8] sm:$0xff] }
 0x185   : > { %v1379_v10 = vsel %vm866_vm2, %v994_v34, 0.0  ;;  %v1410_v15 = vsel %vm897_vm4, %v1025_v62, 0.0 }
 0x186   : > { %v1531_v13 = vadd.f32 %v1530_v12, %v1379_v10  ;;  %v1001_v10 = vld [vmem:[%s2162_s12 + $0x2e0] sm:$0xff]  ;;  %v1016_v12 = vld [vmem:[%s2162_s12 + $0x358] sm:$0xff] }
 0x187   : > { %v2423_v19 = vpop.permute.xlu1 %609  ;;  %v2425_v21 = vpop.permute.xlu0 %672 }
 0x188   : > { %vm867_vm5 = vcmp.ne.f32.partialorder %v2423_v19, 0.0  ;;  %vm882_vm6 = vcmp.ne.f32.partialorder %v2425_v21, 0.0  ;;  %v1571_v19 = vadd.f32 %v1570_v8, %v1409_v4  ;;  %v1031_v4 = vld [vmem:[%s2162_s12 + $0x3d0] sm:$0xff] }
 0x189   : > { %v1380_v2 = vsel %vm867_vm5, %v995_v5, 0.0  ;;  %v1395_v39 = vsel %vm882_vm6, %v1010_v11, 0.0 }
 0x18a   : > { %v1572_v44 = vadd.f32 %v1571_v19, %v1410_v15  ;;  %v1532_v45 = vadd.f32 %v1531_v13, %v1380_v2  ;;  %v1552_v47 = vadd.f32 %v1551_v43, %v1395_v39  ;;  %v1002_v2 = vld [vmem:[%s2162_s12 + $0x2e8] sm:$0xff]  ;;  %v1017_v13 = vld [vmem:[%s2162_s12 + $0x360] sm:$0xff]  ;;  %v1003_v43 = vld [vmem:[%s2162_s12 + $0x2f0] sm:$0xff] }
 0x18b   : > { %v2427_v29 = vpop.permute.xlu1 %676  ;;  %v2429_v26 = vpop.permute.xlu0 %739  ;;  %v1033_v39 = vld [vmem:[%s2162_s12 + $0x3e0] sm:$0xff] }
 0x18c   : > { %vm898_vm7 = vcmp.ne.f32.partialorder %v2429_v26, 0.0  ;;  %vm883_vm9 = vcmp.ne.f32.partialorder %v2427_v29, 0.0  ;;  %v1028_v29 = vld [vmem:[%s2162_s12 + $0x3b8] sm:$0xff] }
 0x18f   : > { %v2431_v27 = vpop.permute.xlu1 %743  ;;  %v2433_v37 = vpop.permute.xlu0 %613 }
 0x190   : > { %vm868_vm8 = vcmp.ne.f32.partialorder %v2433_v37, 0.0  ;;  %vm899_vm10 = vcmp.ne.f32.partialorder %v2431_v27, 0.0  ;;  %v1411_v37 = vsel %vm898_vm7, %v1026_v16, 0.0  ;;  %v1396_v27 = vsel %vm883_vm9, %v1011_v40, 0.0 }
 0x191   : > { %v1381_v46 = vsel %vm868_vm8, %v996_v38, 0.0  ;;  %v1412_v23 = vsel %vm899_vm10, %v1027_v14, 0.0  ;;  %v1573_v49 = vadd.f32 %v1572_v44, %v1411_v37  ;;  %v1553_v57 = vadd.f32 %v1552_v47, %v1396_v27  ;;  %v1034_v47 = vld [vmem:[%s2162_s12 + $0x3e8] sm:$0xff] }
 0x192   : > { %v1533_v53 = vadd.f32 %v1532_v45, %v1381_v46 }
 0x193   : > { %v2435_v18 = vpop.permute.xlu1 %617  ;;  %v2437_v30 = vpop.permute.xlu0 %680  ;;  %v1574_v58 = vadd.f32 %v1573_v49, %v1412_v23 }
 0x194   : > { %vm869_vm11 = vcmp.ne.f32.partialorder %v2435_v18, 0.0  ;;  %vm884_vm12 = vcmp.ne.f32.partialorder %v2437_v30, 0.0 }
 0x195   : > { %v1382_v51 = vsel %vm869_vm11, %v997_v3, 0.0  ;;  %v1397_v54 = vsel %vm884_vm12, %v1012_v28, 0.0  ;;  %v1018_v3 = vld [vmem:[%s2162_s12 + $0x368] sm:$0xff] }
 0x196   : > { %v1554_v61 = vadd.f32 %v1553_v57, %v1397_v54 }
 0x197   : > { %v2439_v31 = vpop.permute.xlu1 %684  ;;  %v2441_v32 = vpop.permute.xlu0 %747 }
 0x198   : > { %vm900_vm13 = vcmp.ne.f32.partialorder %v2441_v32, 0.0  ;;  %vm885_vm15 = vcmp.ne.f32.partialorder %v2439_v31, 0.0 }
 0x199   : > { %v1413_v55 = vsel %vm900_vm13, %v1028_v29, 0.0  ;;  %v1398_v30 = vsel %vm885_vm15, %v1013_v35, 0.0  ;;  %v1035_v35 = vld [vmem:[%s2162_s12 + $0x3f0] sm:$0xff] }
 0x19a   : > { %v1575_v25 = vadd.f32 %v1574_v58, %v1413_v55  ;;  %v1555_v5 = vadd.f32 %v1554_v61, %v1398_v30 }
 0x19b   : > { %v2443_v20 = vpop.permute.xlu1 %751  ;;  %v2445_v33 = vpop.permute.xlu0 %621 }
 0x19c   : > { %vm870_vm14 = vcmp.ne.f32.partialorder %v2445_v33, 0.0  ;;  %vm901_vm0 = vcmp.ne.f32.partialorder %v2443_v20, 0.0  ;;  %v1534_v20 = vadd.f32 %v1533_v53, %v1382_v51  ;;  %v1000_v33 = vld [vmem:[%s2162_s12 + $0x2d8] sm:$0xff] }
 0x19d   : > { %v1383_v31 = vsel %vm870_vm14, %v998_v48, 0.0  ;;  %v1414_v34 = vsel %vm901_vm0, %v1029_v52, 0.0  ;;  %v1004_v52 = vld [vmem:[%s2162_s12 + $0x2f8] sm:$0xff] }
 0x19e   : > { %v1535_v1 = vadd.f32 %v1534_v20, %v1383_v31  ;;  %v1576_v7 = vadd.f32 %v1575_v25, %v1414_v34 }
 0x19f   : > { %v2450_v41 = vpop.permute.xlu1 %625  ;;  %v2452_v42 = vpop.permute.xlu0 %688 }
 0x1a0   : > { %vm871_vm1 = vcmp.ne.f32.partialorder %v2450_v41, 0.0  ;;  %vm886_vm2 = vcmp.ne.f32.partialorder %v2452_v42, 0.0 }
 0x1a1   : > { %v1384_v62 = vsel %vm871_vm1, %v999_v56, 0.0  ;;  %v1399_v42 = vsel %vm886_vm2, %v1014_v59, 0.0 }
 0x1a2   : > { %v1556_v36 = vadd.f32 %v1555_v5, %v1399_v42 }
 0x1a3   : > { %v2463_v50 = vpop.permute.xlu1 %692  ;;  %v2465_v22 = vpop.permute.xlu0 %755 }
 0x1a4   : > { %vm902_vm3 = vcmp.ne.f32.partialorder %v2465_v22, 0.0  ;;  %vm887_vm5 = vcmp.ne.f32.partialorder %v2463_v50, 0.0 }
 0x1a5   : > { %v1415_v8 = vsel %vm902_vm3, %v1030_v60, 0.0  ;;  %v1400_v22 = vsel %vm887_vm5, %v1015_v24, 0.0  ;;  %v1036_v60 = vld [vmem:[%s2162_s12 + $0x3f8] sm:$0xff]  ;;  %vm1606_vm5 = vcmask 1045509  }
 0x1a6   : > { %v1577_v38 = vadd.f32 %v1576_v7, %v1415_v8 }
 0x1a7   : > { %v2481_v63 = vpop.permute.xlu1 %759  ;;  %v2483_v0 = vpop.permute.xlu0 %629 }
 0x1a8   : > { %vm872_vm4 = vcmp.ne.f32.partialorder %v2483_v0, 0.0  ;;  %vm903_vm6 = vcmp.ne.f32.partialorder %v2481_v63, 0.0  ;;  %v1536_v0 = vadd.f32 %v1535_v1, %v1384_v62  ;;  %v1557_v63 = vadd.f32 %v1556_v36, %v1400_v22 }
 0x1a9   : > { %v1385_v11 = vsel %vm872_vm4, %v1000_v33, 0.0  ;;  %v1416_v19 = vsel %vm903_vm6, %v1031_v4, 0.0  ;;  %vm1608_vm6 = vcmask 1046534  }
 0x1aa   : > { %v1537_v40 = vadd.f32 %v1536_v0, %v1385_v11  ;;  %v1578_v44 = vadd.f32 %v1577_v38, %v1416_v19 }
 0x1ab   : > { %v2501_v17 = vpop.permute.xlu1 %633  ;;  %v2503_v21 = vpop.permute.xlu0 %696 }
 0x1ac   : > { %vm873_vm7 = vcmp.ne.f32.partialorder %v2501_v17, 0.0  ;;  %vm888_vm8 = vcmp.ne.f32.partialorder %v2503_v21, 0.0 }
 0x1ad   : > { %v1386_v17 = vsel %vm873_vm7, %v1001_v10, 0.0  ;;  %v1401_v14 = vsel %vm888_vm8, %v1016_v12, 0.0  ;;  %vm1610_vm7 = vcmask 1047559   ;;  %vm1619_vm8 = vcmask 7168  }
 0x1ae   : > { %v1538_v28 = vadd.f32 %v1537_v40, %v1386_v17  ;;  %v1558_v27 = vadd.f32 %v1557_v63, %v1401_v14  ;;  %v1037_v40 = vld [vmem:[#allocation2] sm:$0xff]  ;;  %v1615_v63 = vld [vmem:[#allocation3] sm:$0xff] }
 0x1af   : > { %v2519_v26 = vpop.permute.xlu1 %700  ;;  %v764_v18 = vpop.permute.xlu0 %763 }
 0x1b0   : > { %vm904_vm9 = vcmp.ne.f32.partialorder %v764_v18, 0.0  ;;  %vm889_vm11 = vcmp.ne.f32.partialorder %v2519_v26, 0.0  ;;  %v1019_v18 = vld [vmem:[%s2162_s12 + $0x370] sm:$0xff] }
 0x1b1   : > { %v1417_v50 = vsel %vm904_vm9, %v1032_v6, 0.0  ;;  %v1402_v29 = vsel %vm889_vm11, %v1017_v13, 0.0 }
 0x1b2   : > { %v1579_v23 = vadd.f32 %v1578_v44, %v1417_v50  ;;  %v1559_v53 = vadd.f32 %v1558_v27, %v1402_v29 }
 0x1b3   : > { %v768_v32 = vpop.permute.xlu1 %767  ;;  %v638_v41 = vpop.permute.xlu0 %637 }
 0x1b4   : > { %vm874_vm10 = vcmp.ne.f32.partialorder %v638_v41, 0.0  ;;  %vm905_vm12 = vcmp.ne.f32.partialorder %v768_v32, 0.0  ;;  %v1020_v32 = vld [vmem:[%s2162_s12 + $0x378] sm:$0xff] }
 0x1b5   : > { %v1387_v37 = vsel %vm874_vm10, %v1002_v2, 0.0  ;;  %v1418_v21 = vsel %vm905_vm12, %v1033_v39, 0.0 }
 0x1b6   : > { %v1539_v49 = vadd.f32 %v1538_v28, %v1387_v37  ;;  %v1580_v54 = vadd.f32 %v1579_v23, %v1418_v21 }
 0x1b7   : > { %v642_v15 = vpop.permute.xlu1 %641  ;;  %v705_v16 = vpop.permute.xlu0 %704 }
 0x1b8   : > { %vm875_vm13 = vcmp.ne.f32.partialorder %v642_v15, 0.0  ;;  %vm890_vm14 = vcmp.ne.f32.partialorder %v705_v16, 0.0 }
 0x1b9   : > { %v1388_v48 = vsel %vm875_vm13, %v1003_v43, 0.0  ;;  %v1403_v51 = vsel %vm890_vm14, %v1018_v3, 0.0 }
 0x1ba   : > { %v1540_v57 = vadd.f32 %v1539_v49, %v1388_v48  ;;  %v1560_v31 = vadd.f32 %v1559_v53, %v1403_v51 }
 0x1bb   : > { %v709_v45 = vpop.permute.xlu1 %708  ;;  %v772_v46 = vpop.permute.xlu0 %771 }
 0x1bc   : > { %vm906_vm15 = vcmp.ne.f32.partialorder %v772_v46, 0.0  ;;  %vm891_vm0 = vcmp.ne.f32.partialorder %v709_v45, 0.0  ;;  %v2021_v45 = vmov (!%p1768_p9), 0  }
 0x1bd   : > { %v1419_v55 = vsel %vm906_vm15, %v1034_v47, 0.0  ;;  %v1404_v58 = vsel %vm891_vm0, %v1019_v18, 0.0  ;;  %1887 = vset.pattern.permute.xlu0 (!%p1768_p9), %v2021_v45 }
 0x1be   : > { %v1581_v30 = vadd.f32 %v1580_v54, %v1419_v55  ;;  %v1561_v41 = vadd.f32 %v1560_v31, %v1404_v58 }
 0x1bf   : > { %v776_v56 = vpop.permute.xlu1 %775  ;;  %v646_v26 = vpop.permute.xlu0 %645 }
 0x1c0   : > { %vm907_vm1 = vcmp.ne.f32.partialorder %v776_v56, 0.0  ;;  %vm876_vm2 = vcmp.ne.f32.partialorder %v646_v26, 0.0 }
 0x1c1   : > { %v1420_v59 = vsel %vm907_vm1, %v1035_v35, 0.0  ;;  %v1389_v20 = vsel %vm876_vm2, %v1004_v52, 0.0 }
 0x1c2   : > { %v1541_v34 = vadd.f32 %v1540_v57, %v1389_v20  ;;  %v1582_v62 = vadd.f32 %v1581_v30, %v1420_v59 }
 0x1c3   : > { %v780_v61 = vpop.permute.xlu1 %779  ;;  %v713_v25 = vpop.permute.xlu0 %712 }
 0x1c4   : > { %v1542_v33 = vrot.slane %v1541_v34, 4  ;;  %vm908_vm3 = vcmp.ne.f32.partialorder %v780_v61, 0.0  ;;  %vm892_vm4 = vcmp.ne.f32.partialorder %v713_v25, 0.0 }
 0x1c5   : > { %v1421_v1 = vsel %vm908_vm3, %v1036_v60, 0.0  ;;  %v1405_v42 = vsel %vm892_vm4, %v1020_v32, 0.0 }
 0x1c6   : > { %v1543_v24 = vadd.f32 %v1542_v33, %v1541_v34  ;;  %v1583_v4 = vadd.f32 %v1582_v62, %v1421_v1  ;;  %v1562_v5 = vadd.f32 %v1561_v41, %v1405_v42 }
 0x1c8   : > { %v1544_v7 = vrot.slane %v1543_v24, 2  ;;  %v1584_v8 = vrot.slane %v1583_v4, 4  ;;  %v1563_v10 = vrot.slane %v1562_v5, 4 }
 0x1ca   : > { %v1545_v0 = vadd.f32 %v1544_v7, %v1543_v24  ;;  %v1585_v11 = vadd.f32 %v1584_v8, %v1583_v4  ;;  %v1564_v12 = vadd.f32 %v1563_v10, %v1562_v5 }
 0x1cc   : > { %v1546_v6 = vrot.slane %v1545_v0, 1  ;;  %v1586_v15 = vrot.slane %v1585_v11, 2  ;;  %v1565_v16 = vrot.slane %v1564_v12, 2 }
 0x1ce   : > { %v1587_v36 = vadd.f32 %v1586_v15, %v1585_v11  ;;  %v1566_v22 = vadd.f32 %v1565_v16, %v1564_v12  ;;  %v1547_v19 = vadd.f32 %v1546_v6, %v1545_v0 }
 0x1d0   : > { %v1588_v2 = vrot.slane %v1587_v36, 1  ;;  %v1567_v38 = vrot.slane %v1566_v22, 1  ;;  %v1607_v39 = vsel %vm1606_vm5, %v1547_v19, %v2407_v9 }
 0x1d2   : > { %v1589_v17 = vadd.f32 %v1588_v2, %v1587_v36  ;;  %v1568_v13 = vadd.f32 %v1567_v38, %v1566_v22 }
 0x1d4   : > { %v1609_v14 = vsel %vm1608_vm6, %v1568_v13, %v1607_v39 }
 0x1d5   : > { %v1611_v50 = vsel %vm1610_vm7, %v1589_v17, %v1609_v14 }
 0x1d6   : > { %v1613_v43 = vadd.f32 %v1611_v50, %v1037_v40 }
 0x1d8   : > { %1614 = vst [vmem:[#allocation2] sm:$0xff] %v1613_v43 }
 0x1df   : > { %v1626_v9 = vld [vmem:[#allocation2] sm:$0xff] (!%p1768_p9) }
 0x1fa   : > { %1624 = sbr.rel (%p1768_p9) target bundleno = 662 (0x296), region = 40 }
 0x1fd   : > { %v1617_v44 = vpop.xlane.xlu0 %1616 }
 0x1fe   : > { %v1618_v37 = vadd.f32 %v1617_v44, %v1615_v63 }
 0x200   : > { %1620 = vst.msk [vmem:[#allocation3] sm:$0xff] %vm1619_vm8, %v1618_v37 }
 0x207   : > { %v1625_v3 = vld [vmem:[#allocation3] sm:$0xff] }
 0x208   : > { %1629 = vperm.xlu0 %1887, %v1625_v3  }
 0x287   : > { %v1630_v46 = vpop.permute.xlu0 %1629 }
 0x288   : > { %1888 = vrcp.f32 %v1630_v46 }
 0x292   : > { %v1889_v28 = vpop.eup %1888 }
 0x293   : > { %v1633_v29 = vmul.f32 %v1889_v28, %v1626_v9 }
 0x295   : > { %1634 = vst [vmem:[%s226_s30] sm:$0xff] %v1633_v29 }
 0x296 PF: > { %s1770_s22 = sshll.u32 %s2000_s16, 7  ;;  %s1649_s8 = sshll.u32 %s226_s30, 4  ;;  %s1650_s8 = int_to_ptr.vmem [resolvable:$true] %s1649_s8 }
 0x297   : > { %s2579_s27 = scalar_lea.hbm %s2641_s2, %s1770_s22  ;;  %s1636_s12 = scalar_lea.sflag [#allocation6], %s224_s18 }
 0x298   : > { %s1890_s26 = scalar_lea.vmem %s1650_s8, 128  ;;  %s2022_s7 = smov [#allocation7]  }
 0x299   : > { %p1891_p10 = scmp.ne.s32.totalorder %s1650_s8, %s1890_s26  ;;  %s1894_s25 = sshll.u32 %s2022_s7, 4  ;;  %s1895_s25 = int_to_ptr.vmem [resolvable:$false] %s1894_s25 }
 0x29a   : > { %s1896_s20 = scalar_lea.vmem %s1895_s25, 256  ;;  %p1897_p0 = scmp.lt.s32.totalorder %s1650_s8, %s1895_s25 }
 0x29b   : > { %p1892_p11 = pnand %p1891_p10, %p2120_p12  ;;  %p1898_p2 = scmp.lt.s32.totalorder %s1896_s20, %s1890_s26 }
 0x29d   : > { %p1893_p13 = pneg %p1892_p11  ;;  %p1899_p4 = por %p1898_p2, %p1897_p0 }
 0x29f   : > { %p1900_p5 = pnand %p1899_p4, %p1893_p13 }
 0x2a1   : > { %1903 = shalt.err (!%p1900_p5)
}
 0x2a2   : > { %s1904_s16 = scalar_lea.hbm %s2579_s27, 128  ;;  %s1908_s21 = scalar_lea.hbm %s2641_s2, 256 }
 0x2a3   : > { %p1905_p6 = scmp.ne.s32.totalorder %s2579_s27, %s1904_s16  ;;  %p1909_p7 = scmp.lt.u32.totalorder %s2579_s27, %s2641_s2 }
 0x2a4   : > { %p1910_p9 = scmp.lt.u32.totalorder %s1908_s21, %s1904_s16  ;;  %p1912_p11 = scmp.lt.u32.totalorder %s1904_s16, %s2579_s27 }
 0x2a5   : > { %p1906_p3 = pnand %p1905_p6, %p2120_p12 }
 0x2a6   : > { %p1911_p10 = por %p1910_p9, %p1909_p7 }
 0x2a7   : > { %p1907_p8 = pneg %p1906_p3 }
 0x2a8   : > { %p1913_p13 = por %p1912_p11, %p1911_p10 }
 0x2aa   : > { %p1914_p0 = pnand %p1913_p13, %p1907_p8 }
 0x2ac   : > { %1917 = shalt.err (!%p1914_p0)
}
 0x2ad   : > { %1783 = dma.vmem_to_hbm [thread:$0]  (%p2120_p12), %s1650_s8, 128, %s2579_s27, %s1636_s12  }
 0x2ae PF: > { %p1789_p2 = scmp.ge.s32.totalorder %s2012_s19, 2  ;;  %s1661_s29 = sand.u32 1, %s1972_s9  }
 0x2af   : > { %s1662_s30 = scalar_lea.sflag [#allocation6], %s1661_s29 }
 0x2b0   : > { %p1786_p4 = pnand %p1789_p2, %p2132_p1 }
 0x2b2   : > { %1967 = dma.done.wait (!%p1786_p4), %s1662_s30, 128  }
 0x2b3   : > { %1969 = vsyncadd (!%p1786_p4), %s1662_s30, 4294967168  ;;  %s18_s19 = sadd.s32 1, %s2012_s19   ;;  %s2654_s15 = sld [smem:[#allocation13_spill]] }
 0x2b4   : > { %p15_p5 = scmp.ge.s32.totalorder %s18_s19, 6   ;;  %s2655_s16 = sld [smem:[#allocation14_spill]] }
 0x2b5   : > { %s2656_s17 = sld [smem:[#allocation15_spill]]  ;;  %s2657_s18 = sld [smem:[#allocation16_spill]] }
 0x2b6   : > { %s2658_s9 = smov %s1976_s10  ;;  %s2659_s10 = smov %s1980_s11 }
 0x2b7   : > { %s2660_s11 = smov %s2125_s4  ;;  %s2661_s12 = smov %s1988_s13 }
 0x2b8   : > { %s2662_s13 = smov %s1992_s14  ;;  %s2663_s14 = smov %s2128_s5 }
 0x2b9   :  { %17 = sbr.rel (!%p15_p5) target bundleno = 9 (0x9), region = 89 }
 0x2c0   :  { %1667 = vsyncpa [#allocation5], 1 }
 0x2c1   :  { %1669 = vsyncpa [#allocation5 + $0x1], 1 }
 0x2c2   :  { %1670 = vsyncpa [#allocation6], 1 }
 0x2c3   :  { %1672 = vsyncpa [#allocation6 + $0x1], 1 }

</bundles_post_ra>
